<compile_context>
chip_gen: v5e
topology: v5e:2x2
jax: 0.10.0
libtpu: 0.0.40
codegen_flags: <defaults>
</compile_context>

<pallas_src>
import functools

import jax
import jax.numpy as jnp
from jax import lax
from jax.experimental import pallas as pl
from jax.experimental.pallas import tpu as pltpu

_PARALLEL = getattr(pltpu, "PARALLEL", "parallel")
_CORE_PARALLEL = getattr(pltpu, "CORE_PARALLEL", None)


def _cdiv(a: int, b: int) -> int:
    return -(-a // b)


def _round_up(a: int, b: int) -> int:
    return _cdiv(a, b) * b


def _device_kind() -> str:
    try:
        return jax.devices()[0].device_kind.lower()
    except Exception:
        return ""


def _is_v7x() -> bool:
    kind = _device_kind()
    return ("v7" in kind) or ("7x" in kind)


def _vmem_config():
    """(per-step byte budget incl. temporaries, scoped vmem_limit_bytes)."""
    if _is_v7x():
        # 64 MiB physical VMEM per TensorCore: smaller blocks, clear headroom.
        return 4 * 1024 * 1024, 32 * 1024 * 1024
    # v5e / v6e (128 MiB physical): ~3-8 MiB per step already hits roofline.
    return 8 * 1024 * 1024, 40 * 1024 * 1024


def _run_with_core_parallel_fallback(build, args):
    """On v7x try CORE_PARALLEL on the leading grid axis (shards the grid
    across the chip's 2 TensorCores); fall back to portable PARALLEL if the
    enum is unavailable or lowering rejects it."""
    if _is_v7x() and _CORE_PARALLEL is not None:
        try:
            return build(_CORE_PARALLEL)(*args)
        except Exception:
            pass
    return build(_PARALLEL)(*args)


# ---------------------------------------------------------------------------
# Kernels
# ---------------------------------------------------------------------------
def _repeat_kernel(x_ref, o_ref, *, scale: int, width: int):
    """Generic path.  x_ref: (b_nc, bh, W) -> o_ref: (b_nc, bh, scale*W*scale).

    Lane-direction W-repeat in-kernel; the H-repeat is `scale` slice-stores of
    the same repeated row into consecutive lane ranges of the output block
    (row-major identical to `scale` consecutive output rows).  No output-sized
    concatenate temporary is materialized.
    """
    xr = jnp.repeat(x_ref[...], scale, axis=-1)            # (b_nc, bh, W*s)
    ws = width * scale
    for r in range(scale):                                  # static slices
        o_ref[:, :, r * ws:(r + 1) * ws] = xr


def _matmul_kernel(x_ref, r_ref, o_ref):
    """Lane-folded path (W < 128, float dtypes).

    x_ref: (rows_blk, k*W) holds k consecutive image rows per kernel row.
    r_ref: (k*W, k*s*W*s) constant 0/1 replication matrix (VMEM-resident).
    o_ref: (rows_blk, k*s*W*s): one lane-dense (>=128 wide) store per block.
    The whole nearest-neighbor repeat is a single MXU matmul (exact for 0/1
    weights; HIGHEST precision keeps f32 values exact).
    """
    o_ref[...] = jnp.dot(
        x_ref[...], r_ref[...],
        preferred_element_type=jnp.float32,
        precision=lax.Precision.HIGHEST,
    ).astype(o_ref.dtype)


def _replication_matrix(width: int, scale: int, k: int, dtype) -> jax.Array:
    """0/1 matrix R with R[i, J] = 1 iff output lane J copies input lane i."""
    s, w = scale, width
    kout = k * s * w * s
    j = jnp.arange(kout, dtype=jnp.int32)
    src = (j // (s * w * s)) * w + (j % (w * s)) // s       # source lane per out lane
    i = jnp.arange(k * w, dtype=jnp.int32)
    return (src[None, :] == i[:, None]).astype(dtype)


# ---------------------------------------------------------------------------
# Wrappers
# ---------------------------------------------------------------------------
def _interpolate_matmul(x, s, N, C, H, W, NC, iz, sub,
                        budget, vmem_limit, bytes_accessed):
    # Fold k consecutive image rows into lanes: (NC*H, W) -> (NC*H/k, k*W) is a
    # free row-major view; output (rows, k*s*W*s) is row-major identical to
    # (N, C, H*s, W*s), so the final reshape is free too.
    k = max(1, 128 // W)
    while (NC * H) % k:
        k -= 1
    kw, kout = k * W, k * s * W * s
    rows = (NC * H) // k

    x2 = x.reshape(rows, kw)
    rmat = _replication_matrix(W, s, k, x.dtype)

    # Per-step VMEM *including* the f32 matmul result before the down-cast.
    per_row = (kw + kout) * iz + (kout * 4 if iz < 4 else 0)
    rows_fit = max(1, budget // per_row)
    block_rows = (rows_fit // sub) * sub
    if rows >= 4 * sub:                       # keep >= ~4 grid steps pipelined
        block_rows = min(block_rows, _round_up(_cdiv(rows, 4), sub))
    block_rows = max(sub, min(block_rows, _round_up(rows, sub)))
    grid = (_cdiv(rows, block_rows),)         # cdiv: partial tail block is masked

    def build(lead_sem):
        return pl.pallas_call(
            _matmul_kernel,
            out_shape=jax.ShapeDtypeStruct((rows, kout), x.dtype),
            grid=grid,
            in_specs=[
                pl.BlockSpec((block_rows, kw), lambda i: (i, 0)),
                pl.BlockSpec((kw, kout), lambda i: (0, 0)),   # resident constant
            ],
            out_specs=pl.BlockSpec((block_rows, kout), lambda i: (i, 0)),
            compiler_params=pltpu.CompilerParams(
                dimension_semantics=(lead_sem,),
                vmem_limit_bytes=vmem_limit,
            ),
            cost_estimate=pl.CostEstimate(
                flops=2 * rows * kw * kout,
                transcendentals=0,
                bytes_accessed=bytes_accessed,
            ),
        )

    out2 = _run_with_core_parallel_fallback(build, (x2, rmat))
    return out2.reshape(N, C, H * s, W * s)


def _interpolate_repeat(x, s, N, C, H, W, NC, iz, sub,
                        budget, vmem_limit, bytes_accessed):
    # Generic path: grid over (NC tiles, H tiles); output (NC, H, s*W*s) is
    # row-major identical to (NC, H*s, W*s).
    x3 = x.reshape(NC, H, W)

    # Per-step VMEM including the repeated-row temporary xr (W*s per row).
    per_row = W * (1 + s * s) * iz + W * s * iz
    rows_budget = max(1, budget // per_row)

    if rows_budget >= H:
        block_h = H                                       # whole planes per step
        b_nc = max(1, min(NC, rows_budget // H))
        if NC >= 4:                                       # keep >= ~4 steps in flight
            b_nc = min(b_nc, _cdiv(NC, 4))
        grid = (_cdiv(NC, b_nc), 1)
    else:
        b_nc = 1
        block_h = max(sub, (rows_budget // sub) * sub)    # dtype-aware alignment
        if NC * _cdiv(H, block_h) < 4 and H >= 4 * sub:
            block_h = min(block_h, _round_up(_cdiv(H, 4), sub))
        grid = (NC, _cdiv(H, block_h))                    # cdiv: tail is masked

    kernel = functools.partial(_repeat_kernel, scale=s, width=W)

    def build(lead_sem):
        return pl.pallas_call(
            kernel,
            out_shape=jax.ShapeDtypeStruct((NC, H, s * W * s), x.dtype),
            grid=grid,
            in_specs=[pl.BlockSpec((b_nc, block_h, W), lambda i, h: (i, h, 0))],
            out_specs=pl.BlockSpec((b_nc, block_h, s * W * s),
                                   lambda i, h: (i, h, 0)),
            compiler_params=pltpu.CompilerParams(
                dimension_semantics=(lead_sem, _PARALLEL),
                vmem_limit_bytes=vmem_limit,
            ),
            cost_estimate=pl.CostEstimate(
                flops=0, transcendentals=0, bytes_accessed=bytes_accessed),
        )

    out3 = _run_with_core_parallel_fallback(build, (x3,))
    return out3.reshape(N, C, H * s, W * s)


def interpolate_nearest(x: jax.Array, scale_factor: int = 1) -> jax.Array:
    """Equivalent of F.interpolate(x, scale_factor=scale_factor, mode='nearest')
    for NCHW input and a positive integer scale_factor."""
    if scale_factor != int(scale_factor) or int(scale_factor) < 1:
        raise ValueError("only positive integer scale factors are supported "
                         f"(got {scale_factor!r})")
    s = int(scale_factor)
    if s == 1:
        return x   # identity: skip the HBM round trip entirely

    N, C, H, W = x.shape
    NC = N * C
    iz = jnp.dtype(x.dtype).itemsize
    sub = max(8, 32 // iz)          # sublane packing: 8 f32 / 16 bf16 / 32 int8
    budget, vmem_limit = _vmem_config()
    bytes_accessed = int((1 + s * s) * NC * H * W * iz)

    # Lane-folded MXU path when lanes would otherwise be badly under-filled.
    if W < 128 and jnp.issubdtype(x.dtype, jnp.floating):
        try:
            return _interpolate_matmul(x, s, N, C, H, W, NC, iz, sub,
                                       budget, vmem_limit, bytes_accessed)
        except Exception:
            pass   # guarded: fall back to the always-available generic path

    return _interpolate_repeat(x, s, N, C, H, W, NC, iz, sub,
                               budget, vmem_limit, bytes_accessed)


class Interpolate:
    """Mirror of the PyTorch module (nearest mode, integer scale factor)."""

    def __init__(self, scale_factor=1, mode="nearest"):
        # TODO(synk): only mode='nearest' with an integer scale_factor is
        # implemented (bilinear/bicubic would need a gather + weighted-blend kernel).
        assert mode == "nearest", "only nearest mode implemented"
        self.scale_factor = scale_factor
        self.mode = mode

    def __call__(self, x):
        return interpolate_nearest(x, self.scale_factor)


if __name__ == "__main__":
    key = jax.random.PRNGKey(0)

    # small NCHW input consistent with the module's forward
    x = jax.random.normal(key, (2, 4, 16, 16), dtype=jnp.float32)
    mod = Interpolate(scale_factor=2, mode="nearest")
    out = jax.block_until_ready(mod(x))
    ref = jnp.repeat(jnp.repeat(x, 2, axis=2), 2, axis=3)
    assert out.shape == (2, 4, 32, 32), out.shape
    assert jnp.allclose(out, ref), "mismatch vs reference (f32, s=2)"

    # scale_factor=1 (the module's default) short-circuits to identity
    out1 = jax.block_until_ready(Interpolate()(x))
    assert jnp.allclose(out1, x), "identity case mismatch"

    # bf16, larger scale -> exercises the lane-folded MXU path with s=4
    xb = jax.random.normal(key, (2, 4, 16, 16), dtype=jnp.bfloat16)
    outb = jax.block_until_ready(interpolate_nearest(xb, 4))
    refb = jnp.repeat(jnp.repeat(xb, 4, axis=2), 4, axis=3)
    assert outb.shape == (2, 4, 64, 64) and jnp.array_equal(outb, refb)

    # wide f32 (W >= 128) -> exercises the generic repeat / slice-store path
    xw = jax.random.normal(key, (1, 2, 8, 128), dtype=jnp.float32)
    outw = jax.block_until_ready(interpolate_nearest(xw, 2))
    refw = jnp.repeat(jnp.repeat(xw, 2, axis=2), 2, axis=3)
    assert outw.shape == (1, 2, 16, 256) and jnp.array_equal(outw, refw)

    # integer dtype -> generic path as well (no MXU involvement)
    xi = jax.random.randint(key, (1, 2, 8, 16), -128, 127, dtype=jnp.int32)
    outi = jax.block_until_ready(interpolate_nearest(xi, 2))
    refi = jnp.repeat(jnp.repeat(xi, 2, axis=2), 2, axis=3)
    assert jnp.array_equal(outi, refi), "mismatch vs reference (int32)"

    print("KERNEL_OK")
</pallas_src>

<mosaic_0001>
module attributes {stable_mosaic.version = 11 : i64} {
  func.func @_matmul_kernel(%arg0: i32, %arg1: memref<16x128xf32, #tpu.memory_space<vmem>>, %arg2: memref<128x512xf32, #tpu.memory_space<vmem>>, %arg3: memref<16x512xf32, #tpu.memory_space<vmem>>) attributes {dimension_semantics = [#tpu.dimension_semantics<parallel>], iteration_bounds = array<i64: 1>, scalar_prefetch = 0 : i64, scratch_operands = 0 : i64, tpu.core_type = #tpu.core_type<tc>, window_params = [{transform_indices = @transform_0, window_bounds = array<i64: 16, 128>}, {pipeline_mode = #tpu.pipeline_mode<synchronous>, transform_indices = @transform_1, window_bounds = array<i64: 128, 512>}, {transform_indices = @transform_2, window_bounds = array<i64: 16, 512>}]} {
    %c0 = arith.constant 0 : index
    %c0_0 = arith.constant 0 : index
    %0 = vector.load %arg1[%c0, %c0_0] : memref<16x128xf32, #tpu.memory_space<vmem>>, vector<16x128xf32>
    %c0_1 = arith.constant 0 : index
    %c0_2 = arith.constant 0 : index
    %1 = vector.load %arg2[%c0_1, %c0_2] : memref<128x512xf32, #tpu.memory_space<vmem>>, vector<128x512xf32>
    %cst = arith.constant dense<0.000000e+00> : vector<16x512xf32>
    %2 = tpu.matmul %0, %1, %cst {dimension_numbers = #tpu.dot_dimension_numbers<[1], [0], [0], [1], [0, 0, 1, 1], [], []>, precision = #tpu.contract_precision<fp32>} : vector<16x128xf32>, vector<128x512xf32>, vector<16x512xf32> -> vector<16x512xf32>
    %c0_3 = arith.constant 0 : index
    %c0_4 = arith.constant 0 : index
    %3 = vector.load %arg3[%c0_3, %c0_4] : memref<16x512xf32, #tpu.memory_space<vmem>>, vector<16x512xf32>
    tpu.vector_store %arg3[%c0_3, %c0_4], %2 {strides = array<i32>} : memref<16x512xf32, #tpu.memory_space<vmem>>, vector<16x512xf32>,
    return
  }
  func.func @transform_0(%arg0: i32) -> (i32, i32) {
    %c0_i32 = arith.constant 0 : i32
    %c0_i32_0 = arith.constant 0 : i32
    return %arg0, %c0_i32 : i32, i32
  }
  func.func @transform_1(%arg0: i32) -> (i32, i32) {
    %c0_i32 = arith.constant 0 : i32
    %c0_i32_0 = arith.constant 0 : i32
    %c0_i32_1 = arith.constant 0 : i32
    return %c0_i32, %c0_i32_0 : i32, i32
  }
  func.func @transform_2(%arg0: i32) -> (i32, i32) {
    %c0_i32 = arith.constant 0 : i32
    %c0_i32_0 = arith.constant 0 : i32
    return %arg0, %c0_i32 : i32, i32
  }
}

module attributes {stable_mosaic.version = 11 : i64} {
  func.func @_repeat_kernel(%arg0: i32, %arg1: i32, %arg2: memref<2x16x16xf32, #tpu.memory_space<vmem>>, %arg3: memref<2x16x64xf32, #tpu.memory_space<vmem>>) attributes {dimension_semantics = [#tpu.dimension_semantics<parallel>, #tpu.dimension_semantics<parallel>], iteration_bounds = array<i64: 4, 1>, scalar_prefetch = 0 : i64, scratch_operands = 0 : i64, tpu.core_type = #tpu.core_type<tc>, window_params = [{transform_indices = @transform_0, window_bounds = array<i64: 2, 16, 16>}, {transform_indices = @transform_1, window_bounds = array<i64: 2, 16, 64>}]} {
    %c0 = arith.constant 0 : index
    %c0_0 = arith.constant 0 : index
    %c0_1 = arith.constant 0 : index
    %0 = vector.load %arg2[%c0, %c0_0, %c0_1] : memref<2x16x16xf32, #tpu.memory_space<vmem>>, vector<2x16x16xf32>
    %1 = vector.shape_cast %0 : vector<2x16x16xf32> to vector<2x16x16x1xf32>
    %2 = vector.broadcast %1 : vector<2x16x16x1xf32> to vector<2x16x16x2xf32>
    %3 = vector.shape_cast %2 : vector<2x16x16x2xf32> to vector<2x16x32xf32>
    %c0_2 = arith.constant 0 : index
    %c0_3 = arith.constant 0 : index
    %c0_4 = arith.constant 0 : index
    %4 = vector.load %arg3[%c0_2, %c0_3, %c0_4] : memref<2x16x64xf32, #tpu.memory_space<vmem>>, vector<2x16x32xf32>
    tpu.vector_store %arg3[%c0_2, %c0_3, %c0_4], %3 {strides = array<i32>} : memref<2x16x64xf32, #tpu.memory_space<vmem>>, vector<2x16x32xf32>,
    %c0_5 = arith.constant 0 : index
    %c0_6 = arith.constant 0 : index
    %c32 = arith.constant 32 : index
    %5 = vector.load %arg3[%c0_5, %c0_6, %c32] : memref<2x16x64xf32, #tpu.memory_space<vmem>>, vector<2x16x32xf32>
    tpu.vector_store %arg3[%c0_5, %c0_6, %c32], %3 {strides = array<i32>} : memref<2x16x64xf32, #tpu.memory_space<vmem>>, vector<2x16x32xf32>,
    return
  }
  func.func @transform_0(%arg0: i32, %arg1: i32) -> (i32, i32, i32) {
    %c0_i32 = arith.constant 0 : i32
    %c0_i32_0 = arith.constant 0 : i32
    return %arg0, %arg1, %c0_i32 : i32, i32, i32
  }
  func.func @transform_1(%arg0: i32, %arg1: i32) -> (i32, i32, i32) {
    %c0_i32 = arith.constant 0 : i32
    %c0_i32_0 = arith.constant 0 : i32
    return %arg0, %arg1, %c0_i32 : i32, i32, i32
  }
}

</mosaic_0001>

<bundles_post_ra>
// kernel: tpu_custom_call.1
= control target key start
LH: loop header
LB: loop body
LE: loop exit
PB: predicated region body
PF: predicated region fallthrough
CT: control target
= control target key end

     0   :  { %7 = vsyncpa [#allocation3], 0  ;;  %s2780_s0 = inlined_call_operand.hbm [shape: f32[16,128], index: 0, kind: input, shape index: {}]   ;;  %s2781_s1 = inlined_call_operand.hbm [shape: f32[128,512], index: 1, kind: input, shape index: {}]   ;;  %s2782_s2 = inlined_call_operand.hbm [shape: f32[16,512], index: 2, kind: output, shape index: {}]  }
   0x1   :  { %8 = vsyncpa [#allocation6], 0 }
   0x2   :  { %9 = vsyncpa [#allocation4], 0  ;;  %s14_s11 = sshll.u32 %s2780_s0, 4  ;;  %s1711_s12 = smov [#allocation2]   ;;  %s15_s11 = int_to_ptr.hbm [resolvable:$true] %s14_s11 }
   0x3   :  { %s16_s13 = sshll.u32 %s1711_s12, 4  ;;  %s27_s16 = sshll.u32 %s2781_s1, 4  ;;  %s17_s13 = int_to_ptr.vmem [resolvable:$true] %s16_s13  ;;  %s28_s16 = int_to_ptr.hbm [resolvable:$true] %s27_s16 }
   0x4   :  { %s1712_s17 = smov 128   ;;  %s1713_s18 = smov 8  }
   0x5   :  { %22 = dma.hbm_to_vmem [thread:$0]  %s15_s11, 256, %s17_s13, [#allocation3], %s1712_s17, %s1712_s17, %s1713_s18  }
   0x6   :  { %s1714_s19 = smov [#allocation5]   ;;  %s1715_s21 = smov 512  }
   0x7   :  { %s29_s20 = sshll.u32 %s1714_s19, 4  ;;  %s1716_s22 = smov 32   ;;  %s30_s20 = int_to_ptr.vmem [resolvable:$true] %s29_s20 }
   0x8   :  { %35 = dma.hbm_to_vmem [thread:$0]  %s28_s16, 8192, %s30_s20, [#allocation6], %s1715_s21, %s1715_s21, %s1716_s22  }
   0x9   :  { %1705 = dma.done.wait [#allocation3], 256  }
   0xa   :  { %1706 = vsyncadd [#allocation3], 4294967040 }
   0xb   :  { %1707 = dma.done.wait [#allocation6], 8192  }
   0xc   :  { %1708 = vsyncadd [#allocation6], 4294959104  ;;  %v106_v0 = vld [vmem:[#allocation5 + $0x1e0] sm:$0xff]  ;;  %v107_v59 = vld [vmem:[#allocation5 + $0x1e8] sm:$0xff]  ;;  %s1717_s0 = smov [#allocation7]   ;;  %s1612_s25 = sshll.u32 %s2782_s2, 4  ;;  %s1613_s25 = int_to_ptr.hbm [resolvable:$true] %s1612_s25 }
   0xd   :  { %v102_v1 = vld [vmem:[#allocation5 + $0x1c0] sm:$0xff]  ;;  %v1742_v3 = vand.u32 4294901760, %v106_v0  ;;  %s1610_s1 = sshll.u32 %s1717_s0, 4  ;;  %s1611_s1 = int_to_ptr.vmem [resolvable:$true] %s1610_s1 }
   0xe   :  { %v98_v2 = vld [vmem:[#allocation5 + $0x1a0] sm:$0xff]  ;;  %v1744_v4 = vand.u32 4294901760, %v102_v1 }
   0xf   :  { %v1746_v5 = vand.u32 4294901760, %v98_v2  ;;  %v94_v6 = vld [vmem:[#allocation5 + $0x180] sm:$0xff]  ;;  %111 = vmatpush.msra.mxu0 %v1742_v3  ;;  %v1756_v14 = vsub.f32 %v106_v0, %v1742_v3  ;;  %324 = vmatpush.msra.mxu3 %v1742_v3 }
  0x10   :  { %v90_v7 = vld [vmem:[#allocation5 + $0x160] sm:$0xff]  ;;  %v1748_v9 = vand.u32 4294901760, %v94_v6  ;;  %v1759_v15 = vsub.f32 %v102_v1, %v1744_v4 }
  0x11   :  { %v86_v8 = vld [vmem:[#allocation5 + $0x140] sm:$0xff]  ;;  %v1750_v10 = vand.u32 4294901760, %v90_v7  ;;  %v1763_v16 = vsub.f32 %v98_v2, %v1746_v5  ;;  %113 = vmatpush.msra.mxu0 %v1744_v4  ;;  %266 = vmatpush.msra.mxu2 %v1756_v14  ;;  %v161_v22 = vand.u32 4294901760, %v1756_v14  ;;  %v103_v2 = vld [vmem:[#allocation5 + $0x1c8] sm:$0xff] }
  0x12   :  { %v1752_v11 = vand.u32 4294901760, %v86_v8  ;;  %v82_v12 = vld [vmem:[#allocation5 + $0x120] sm:$0xff]  ;;  %v1768_v19 = vsub.f32 %v94_v6, %v1748_v9  ;;  %v2798_v23 = vand.u32 4294901760, %v1759_v15  ;;  %326 = vmatpush.msra.mxu3 %v1744_v4 }
  0x13   :  { %v78_v13 = vld [vmem:[#allocation5 + $0x100] sm:$0xff]  ;;  %v1765_v17 = vand.u32 4294901760, %v82_v12  ;;  %v1771_v20 = vsub.f32 %v90_v7, %v1750_v10  ;;  %v2796_v24 = vand.u32 4294901760, %v1763_v16  ;;  %115 = vmatpush.msra.mxu0 %v1746_v5  ;;  %269 = vmatpush.msra.mxu2 %v1759_v15  ;;  %v162_v30 = vsub.f32 %v1756_v14, %v161_v22 }
  0x14   :  { %v74_v18 = vld [vmem:[#allocation5 + $0xe0] sm:$0xff]  ;;  %v1774_v21 = vsub.f32 %v86_v8, %v1752_v11  ;;  %v1781_v25 = vand.u32 4294901760, %v78_v13  ;;  %v2795_v27 = vand.u32 4294901760, %v1768_v19  ;;  %v168_v31 = vsub.f32 %v1759_v15, %v2798_v23  ;;  %328 = vmatpush.msra.mxu3 %v1746_v5  ;;  %v71_v23 = vld [vmem:[#allocation5 + $0xc8] sm:$0xff] }
  0x15   :  { %v70_v26 = vld [vmem:[#allocation5 + $0xc0] sm:$0xff]  ;;  %v1785_v28 = vand.u32 4294901760, %v74_v18  ;;  %v1788_v29 = vsub.f32 %v82_v12, %v1765_v17  ;;  %v174_v32 = vsub.f32 %v1763_v16, %v2796_v24  ;;  %v2792_v33 = vand.u32 4294901760, %v1771_v20  ;;  %117 = vmatpush.msra.mxu0 %v1748_v9  ;;  %272 = vmatpush.msra.mxu2 %v1763_v16 }
  0x16   :  { %v66_v34 = vld [vmem:[#allocation5 + $0xa0] sm:$0xff]  ;;  %v1803_v35 = vand.u32 4294901760, %v70_v26  ;;  %v2790_v36 = vand.u32 4294901760, %v1774_v21  ;;  %v163_v37 = vand.u32 4294901760, %v162_v30  ;;  %v169_v38 = vand.u32 4294901760, %v168_v31  ;;  %330 = vmatpush.msra.mxu3 %v1748_v9 }
  0x17   :  { %v180_v39 = vsub.f32 %v1768_v19, %v2795_v27  ;;  %v1812_v40 = vsub.f32 %v78_v13, %v1781_v25  ;;  %v1815_v41 = vand.u32 4294901760, %v66_v34  ;;  %v62_v42 = vld [vmem:[#allocation5 + $0x80] sm:$0xff]  ;;  %119 = vmatpush.msra.mxu0 %v1750_v10  ;;  %v175_v43 = vand.u32 4294901760, %v174_v32  ;;  %275 = vmatpush.msra.mxu2 %v1768_v19  ;;  %v99_v32 = vld [vmem:[#allocation5 + $0x1a8] sm:$0xff] }
  0x18   :  { %164 = vmatpush.msra.mxu1 %v163_v37  ;;  %v186_v44 = vsub.f32 %v1771_v20, %v2792_v33  ;;  %v2789_v45 = vand.u32 4294901760, %v1788_v29  ;;  %v1823_v46 = vsub.f32 %v74_v18, %v1785_v28  ;;  %332 = vmatpush.msra.mxu3 %v1750_v10  ;;  %v1828_v47 = vsub.f32 %v70_v26, %v1803_v35  ;;  %v58_v48 = vld [vmem:[#allocation5 + $0x60] sm:$0xff] }
  0x19   :  { %121 = vmatpush.msra.mxu0 %v1752_v11  ;;  %v181_v49 = vand.u32 4294901760, %v180_v39  ;;  %v192_v50 = vsub.f32 %v1774_v21, %v2790_v36  ;;  %v1834_v51 = vand.u32 4294901760, %v62_v42  ;;  %v2788_v52 = vand.u32 4294901760, %v1812_v40  ;;  %278 = vmatpush.msra.mxu2 %v1771_v20  ;;  %v54_v54 = vld [vmem:[#allocation5 + $0x40] sm:$0xff] }
  0x1a   :  { %170 = vmatpush.msra.mxu1 %v169_v38  ;;  %334 = vmatpush.msra.mxu3 %v1752_v11  ;;  %v1840_v53 = vsub.f32 %v66_v34, %v1815_v41  ;;  %v187_v55 = vand.u32 4294901760, %v186_v44  ;;  %v198_v56 = vsub.f32 %v1788_v29, %v2789_v45  ;;  %v1846_v57 = vand.u32 4294901760, %v58_v48  ;;  %v50_v61 = vld [vmem:[#allocation5 + $0x20] sm:$0xff]  ;;  %v95_v44 = vld [vmem:[#allocation5 + $0x188] sm:$0xff] }
  0x1b   :  { %123 = vmatpush.msra.mxu0 %v1765_v17  ;;  %v2786_v58 = vand.u32 4294901760, %v1823_v46  ;;  %281 = vmatpush.msra.mxu2 %v1774_v21  ;;  %v2785_v60 = vand.u32 4294901760, %v1828_v47  ;;  %v193_v62 = vand.u32 4294901760, %v192_v50  ;;  %v204_v63 = vsub.f32 %v1812_v40, %v2788_v52  ;;  %v46_v7 = vld [vmem:[#allocation5] sm:$0xff] }
  0x1c   :  { %176 = vmatpush.msra.mxu1 %v175_v43  ;;  %336 = vmatpush.msra.mxu3 %v1765_v17  ;;  %v1856_v0 = vand.u32 4294901760, %v54_v54  ;;  %v1859_v1 = vsub.f32 %v62_v42, %v1834_v51  ;;  %v2784_v6 = vand.u32 4294901760, %v1840_v53  ;;  %v1864_v8 = vand.u32 4294901760, %v107_v59 }
  0x1d   :  { %125 = vmatpush.msra.mxu0 %v1781_v25  ;;  %284 = vmatpush.msra.mxu2 %v1788_v29  ;;  %v199_v12 = vand.u32 4294901760, %v198_v56  ;;  %v210_v13 = vsub.f32 %v1823_v46, %v2786_v58  ;;  %v1870_v18 = vand.u32 4294901760, %v50_v61  ;;  %v1873_v26 = vsub.f32 %v58_v48, %v1846_v57 }
  0x1e   :  { %182 = vmatpush.msra.mxu1 %v181_v49  ;;  %338 = vmatpush.msra.mxu3 %v1781_v25  ;;  %v216_v30 = vsub.f32 %v1828_v47, %v2785_v60  ;;  %v1880_v31 = vand.u32 4294901760, %v103_v2  ;;  %v205_v34 = vand.u32 4294901760, %v204_v63  ;;  %v1883_v37 = vand.u32 4294901760, %v46_v7  ;;  %v83_v60 = vld [vmem:[#allocation5 + $0x128] sm:$0xff] }
  0x1f   :  { %127 = vmatpush.msra.mxu0 %v1785_v28  ;;  %287 = vmatpush.msra.mxu2 %v1812_v40  ;;  %v2783_v38 = vand.u32 4294901760, %v1859_v1  ;;  %v1887_v39 = vsub.f32 %v54_v54, %v1856_v0  ;;  %v222_v42 = vsub.f32 %v1840_v53, %v2784_v6  ;;  %v1895_v43 = vsub.f32 %v107_v59, %v1864_v8  ;;  %v91_v59 = vld [vmem:[#allocation5 + $0x168] sm:$0xff] }
  0x20   :  { %188 = vmatpush.msra.mxu1 %v187_v55  ;;  %340 = vmatpush.msra.mxu3 %v1785_v28  ;;  %2830 = vst [vmem:[#allocation11_spill] sm:$0xff] %v1883_v37  ;;  %v211_v48 = vand.u32 4294901760, %v210_v13  ;;  %v2787_v49 = vand.u32 4294901760, %v1873_v26  ;;  %v1900_v50 = vsub.f32 %v50_v61, %v1870_v18  ;;  %v1902_v54 = vand.u32 4294901760, %v99_v32  ;;  %v87_v13 = vld [vmem:[#allocation5 + $0x148] sm:$0xff] }
  0x21   :  { %129 = vmatpush.msra.mxu0 %v1803_v35  ;;  %290 = vmatpush.msra.mxu2 %v1823_v46  ;;  %v217_v55 = vand.u32 4294901760, %v216_v30  ;;  %v1907_v56 = vsub.f32 %v103_v2, %v1880_v31  ;;  %v2791_v61 = vand.u32 4294901760, %v1887_v39  ;;  %v1915_v63 = vsub.f32 %v46_v7, %v1883_v37 }
  0x22   :  { %194 = vmatpush.msra.mxu1 %v193_v62  ;;  %342 = vmatpush.msra.mxu3 %v1803_v35  ;;  %v228_v62 = vsub.f32 %v1859_v1, %v2783_v38  ;;  %v223_v2 = vand.u32 4294901760, %v222_v42  ;;  %v2793_v30 = vand.u32 4294901760, %v1895_v43  ;;  %v2794_v7 = vand.u32 4294901760, %v1900_v50 }
  0x23   :  { %131 = vmatpush.msra.mxu0 %v1815_v41  ;;  %293 = vmatpush.msra.mxu2 %v1828_v47  ;;  %v1928_v38 = vsub.f32 %v99_v32, %v1902_v54  ;;  %v1930_v6 = vand.u32 4294901760, %v91_v59  ;;  %v2797_v42 = vand.u32 4294901760, %v1907_v56  ;;  %v1935_v58 = vand.u32 4294901760, %v87_v13 }
  0x24   :  { %200 = vmatpush.msra.mxu1 %v199_v12  ;;  %344 = vmatpush.msra.mxu3 %v1815_v41  ;;  %v1917_v12 = vand.u32 4294901760, %v95_v44  ;;  %v240_v32 = vsub.f32 %v1887_v39, %v2791_v61  ;;  %v534_v45 = vsub.f32 %v1895_v43, %v2793_v30  ;;  %v1950_v36 = vand.u32 4294901760, %v83_v60 }
  0x25   :  { %133 = vmatpush.msra.mxu0 %v1834_v51  ;;  %296 = vmatpush.msra.mxu2 %v1840_v53  ;;  %v2800_v61 = vand.u32 4294901760, %v1928_v38  ;;  %v1958_v33 = vsub.f32 %v91_v59, %v1930_v6  ;;  %v540_v30 = vsub.f32 %v1907_v56, %v2797_v42  ;;  %v2831_v14 = vand.u32 4294901760, %v1759_v15 }
  0x26   :  { %206 = vmatpush.msra.mxu1 %v205_v34  ;;  %346 = vmatpush.msra.mxu3 %v1834_v51  ;;  %v234_v34 = vsub.f32 %v1873_v26, %v2787_v49  ;;  %v2799_v49 = vand.u32 4294901760, %v1915_v63  ;;  %v1943_v52 = vsub.f32 %v95_v44, %v1917_v12  ;;  %v246_v44 = vsub.f32 %v1900_v50, %v2794_v7 }
  0x27   :  { %135 = vmatpush.msra.mxu0 %v1846_v57  ;;  %299 = vmatpush.msra.mxu2 %v1859_v1  ;;  %v241_v7 = vand.u32 4294901760, %v240_v32  ;;  %v1979_v42 = vsub.f32 %v83_v60, %v1950_v36  ;;  %v546_v32 = vsub.f32 %v1928_v38, %v2800_v61  ;;  %v67_v60 = vld [vmem:[#allocation5 + $0xa8] sm:$0xff]  ;;  %v2833_v15 = vand.u32 4294901760, %v1763_v16 }
  0x28   :  { %212 = vmatpush.msra.mxu1 %v211_v48  ;;  %348 = vmatpush.msra.mxu3 %v1846_v57  ;;  %v229_v48 = vand.u32 4294901760, %v228_v62  ;;  %v235_v62 = vand.u32 4294901760, %v234_v34  ;;  %v75_v34 = vld [vmem:[#allocation5 + $0xe8] sm:$0xff]  ;;  %v252_v59 = vsub.f32 %v1915_v63, %v2799_v49  ;;  %v2835_v16 = vand.u32 4294901760, %v1768_v19 }
  0x29   :  { %137 = vmatpush.msra.mxu0 %v1856_v0  ;;  %302 = vmatpush.msra.mxu2 %v1873_v26  ;;  %v1986_v27 = vand.u32 4294901760, %v75_v34  ;;  %v2837_v19 = vand.u32 4294901760, %v1771_v20  ;;  %v2839_v20 = vand.u32 4294901760, %v1774_v21  ;;  %v2841_v21 = vand.u32 4294901760, %v1788_v29  ;;  %v45_v29 = vld [vmem:[#allocation2 + $0x8] sm:$0xff] }
  0x2a   :  { %218 = vmatpush.msra.mxu1 %v217_v55  ;;  %350 = vmatpush.msra.mxu3 %v1856_v0  ;;  %v79_v55 = vld [vmem:[#allocation5 + $0x108] sm:$0xff] }
  0x2b   :  { %139 = vmatpush.msra.mxu0 %v1870_v18  ;;  %305 = vmatpush.msra.mxu2 %v1887_v39  ;;  %v1973_v24 = vand.u32 4294901760, %v79_v55 }
  0x2c   :  { %224 = vmatpush.msra.mxu1 %v223_v2  ;;  %352 = vmatpush.msra.mxu3 %v1870_v18  ;;  %v1966_v2 = vsub.f32 %v87_v13, %v1935_v58  ;;  %v535_v13 = vand.u32 4294901760, %v534_v45  ;;  %v2011_v45 = vand.u32 4294901760, %v67_v60 }
  0x2d   :  { %141 = vmatpush.msra.mxu0 %v1883_v37  ;;  %308 = vmatpush.msra.mxu2 %v1900_v50  ;;  %v1997_v49 = vsub.f32 %v79_v55, %v1973_v24  ;;  %v2009_v55 = vsub.f32 %v75_v34, %v1986_v27 }
  0x2e   :  { %230 = vmatpush.msra.mxu1 %v229_v48  ;;  %v247_v48 = vand.u32 4294901760, %v246_v44  ;;  %354 = vmatpush.msra.mxu3 %v1883_v37  ;;  %v2832_v44 = vand.u32 4294901760, %v1943_v52  ;;  %v1999_v37 = vand.u32 4294901760, %v71_v23 }
  0x2f   :  { %371 = vmatpush.msrb.mxu0 %v161_v22  ;;  %311 = vmatpush.msra.mxu2 %v1915_v63  ;;  %v541_v22 = vand.u32 4294901760, %v540_v30 }
  0x30   :  { %236 = vmatpush.msra.mxu1 %v235_v62  ;;  %v253_v62 = vand.u32 4294901760, %v252_v59  ;;  %v552_v61 = vsub.f32 %v1943_v52, %v2832_v44  ;;  %536 = vmatpush.msrb.mxu3 %v535_v13  ;;  %v2834_v59 = vand.u32 4294901760, %v1958_v33  ;;  %v2836_v13 = vand.u32 4294901760, %v1966_v2 }
  0x31   :  { %375 = vmatpush.msrb.mxu0 %v2831_v14  ;;  %483 = vmatpush.msrb.mxu2 %v1864_v8  ;;  %v44_v14 = vld [vmem:[#allocation2] sm:$0xff]  ;;  %v2021_v34 = vsub.f32 %v71_v23, %v1999_v37 }
  0x32   :  { %242 = vmatpush.msra.mxu1 %v241_v7  ;;  %v547_v7 = vand.u32 4294901760, %v546_v32  ;;  %v558_v44 = vsub.f32 %v1958_v33, %v2834_v59  ;;  %542 = vmatpush.msrb.mxu3 %v541_v22  ;;  %v553_v32 = vand.u32 4294901760, %v552_v61  ;;  %v2023_v30 = vand.u32 4294901760, %v44_v14 }
  0x33   :  { %379 = vmatpush.msrb.mxu0 %v2833_v15  ;;  %485 = vmatpush.msrb.mxu2 %v1880_v31  ;;  %v63_v15 = vld [vmem:[#allocation5 + $0x88] sm:$0xff]  ;;  %v2838_v22 = vand.u32 4294901760, %v1979_v42  ;;  %v2036_v59 = vsub.f32 %v67_v60, %v2011_v45 }
  0x34   :  { %248 = vmatpush.msra.mxu1 %v247_v48  ;;  %v564_v48 = vsub.f32 %v1966_v2, %v2836_v13  ;;  %548 = vmatpush.msrb.mxu3 %v547_v7  ;;  %v559_v61 = vand.u32 4294901760, %v558_v44  ;;  %v2033_v23 = vand.u32 4294901760, %v63_v15  ;;  %v2840_v7 = vand.u32 4294901760, %v1997_v49 }
  0x35   :  { %383 = vmatpush.msrb.mxu0 %v2835_v16  ;;  %487 = vmatpush.msrb.mxu2 %v1902_v54  ;;  %v570_v16 = vsub.f32 %v1979_v42, %v2838_v22  ;;  %v2047_v13 = vsub.f32 %v44_v14, %v2023_v30  ;;  %v51_v22 = vld [vmem:[#allocation5 + $0x28] sm:$0xff] }
  0x36   :  { %254 = vmatpush.msra.mxu1 %v253_v62  ;;  %v59_v62 = vld [vmem:[#allocation5 + $0x68] sm:$0xff]  ;;  %554 = vmatpush.msrb.mxu3 %v553_v32  ;;  %v576_v44 = vsub.f32 %v1997_v49, %v2840_v7  ;;  %v2060_v14 = vsub.f32 %v63_v15, %v2033_v23 }
  0x37   :  { %387 = vmatpush.msrb.mxu0 %v2837_v19  ;;  %489 = vmatpush.msrb.mxu2 %v1917_v12  ;;  %v55_v19 = vld [vmem:[#allocation5 + $0x48] sm:$0xff]  ;;  %v2049_v60 = vand.u32 4294901760, %v59_v62  ;;  %v2072_v15 = vand.u32 4294901760, %v2047_v13 }
  0x38   :  { %442 = vmatpush.msrb.mxu1 %v1742_v3  ;;  %v565_v3 = vand.u32 4294901760, %v564_v48  ;;  %560 = vmatpush.msrb.mxu3 %v559_v61  ;;  %v2842_v48 = vand.u32 4294901760, %v2009_v55  ;;  %v2062_v7 = vand.u32 4294901760, %v55_v19 }
  0x39   :  { %391 = vmatpush.msrb.mxu0 %v2839_v20  ;;  %491 = vmatpush.msrb.mxu2 %v1930_v6  ;;  %2845 = vst [vmem:[#allocation12_spill] sm:$0xff] %v2072_v15  ;;  %v2846_v20 = vand.u32 4294901760, %v1823_v46 }
  0x3a   :  { %444 = vmatpush.msrb.mxu1 %v1744_v4  ;;  %v571_v4 = vand.u32 4294901760, %v570_v16  ;;  %v582_v32 = vsub.f32 %v2009_v55, %v2842_v48  ;;  %566 = vmatpush.msrb.mxu3 %v565_v3  ;;  %v2844_v16 = vand.u32 4294901760, %v2021_v34  ;;  %v2075_v48 = vsub.f32 %v59_v62, %v2049_v60 }
  0x3b   :  { %395 = vmatpush.msrb.mxu0 %v2841_v21  ;;  %493 = vmatpush.msrb.mxu2 %v1935_v58  ;;  %v2843_v21 = vand.u32 4294901760, %v1812_v40  ;;  %v47_v40 = vld [vmem:[#allocation5 + $0x8] sm:$0xff]  ;;  %v2082_v3 = vand.u32 4294901760, %v45_v29  ;;  %v2090_v46 = vsub.f32 %v55_v19, %v2062_v7  ;;  %v2849_v62 = vand.u32 4294901760, %v1840_v53 }
  0x3c   :  { %446 = vmatpush.msrb.mxu1 %v1746_v5  ;;  %v577_v5 = vand.u32 4294901760, %v576_v44  ;;  %v588_v61 = vsub.f32 %v2021_v34, %v2844_v16  ;;  %572 = vmatpush.msrb.mxu3 %v571_v4  ;;  %v583_v44 = vand.u32 4294901760, %v582_v32  ;;  %v145_v4 = vsub.f32 %v2047_v13, %v2072_v15 }
  0x3d   :  { %399 = vmatpush.msrb.mxu0 %v2843_v21  ;;  %495 = vmatpush.msrb.mxu2 %v1950_v36  ;;  %v2847_v21 = vand.u32 4294901760, %v2036_v59  ;;  %v605_v32 = vand.u32 4294901760, %v2075_v48  ;;  %v2852_v53 = vand.u32 4294901760, %v1859_v1 }
  0x3e   :  { %448 = vmatpush.msrb.mxu1 %v1748_v9  ;;  %v2080_v9 = vand.u32 4294901760, %v51_v22  ;;  %578 = vmatpush.msrb.mxu3 %v577_v5  ;;  %v2851_v5 = vand.u32 4294901760, %v2060_v14 }
  0x3f   :  { %403 = vmatpush.msrb.mxu0 %v2846_v20  ;;  %497 = vmatpush.msrb.mxu2 %v1973_v24  ;;  %v594_v16 = vsub.f32 %v2036_v59, %v2847_v21  ;;  %v589_v20 = vand.u32 4294901760, %v588_v61  ;;  %v2099_v21 = vand.u32 4294901760, %v47_v40 }
  0x40   :  { %450 = vmatpush.msrb.mxu1 %v1750_v10  ;;  %v2848_v10 = vand.u32 4294901760, %v1828_v47  ;;  %v2105_v47 = vsub.f32 %v51_v22, %v2080_v9  ;;  %584 = vmatpush.msrb.mxu3 %v583_v44  ;;  %v600_v61 = vsub.f32 %v2060_v14, %v2851_v5  ;;  %v606_v22 = vsub.f32 %v2075_v48, %v605_v32 }
  0x41   :  { %499 = vmatpush.msrb.mxu2 %v1986_v27  ;;  %v595_v19 = vand.u32 4294901760, %v594_v16  ;;  %v2853_v44 = vand.u32 4294901760, %v1873_v26  ;;  %256 = vmatmul.f32.vlgmr.msra.gmra.mxu1 %v2023_v30 }
  0x42   :  { %407 = vmatpush.msrb.mxu0 %v2848_v10  ;;  %452 = vmatpush.msrb.mxu1 %v1752_v11  ;;  %v2108_v11 = vsub.f32 %v45_v29, %v2082_v3  ;;  %v611_v10 = vand.u32 4294901760, %v2090_v46  ;;  %v2125_v29 = vsub.f32 %v47_v40, %v2099_v21  ;;  %v617_v1 = vand.u32 4294901760, %v2105_v47 }
  0x43   :  { %501 = vmatpush.msrb.mxu2 %v1999_v37  ;;  %590 = vmatpush.msrb.mxu3 %v589_v20  ;;  %v601_v16 = vand.u32 4294901760, %v600_v61  ;;  %v2855_v40 = vand.u32 4294901760, %v1887_v39  ;;  %v2856_v20 = vand.u32 4294901760, %v1900_v50 }
  0x44   :  { %411 = vmatpush.msrb.mxu0 %v2849_v62  ;;  %454 = vmatpush.msrb.mxu1 %v1765_v17  ;;  %2850 = vst [vmem:[#allocation13_spill] sm:$0xff] %v2108_v11  ;;  %v2119_v17 = vand.u32 4294901760, %v145_v4  ;;  %v612_v62 = vsub.f32 %v2090_v46, %v611_v10  ;;  %v623_v26 = vand.u32 4294901760, %v2125_v29  ;;  %v618_v4 = vsub.f32 %v2105_v47, %v617_v1 }
  0x45   :  { %503 = vmatpush.msrb.mxu2 %v2011_v45  ;;  %596 = vmatpush.msrb.mxu3 %v595_v19  ;;  %v2857_v19 = vand.u32 4294901760, %v1915_v63  ;;  %v2861_v63 = vld [vmem:[#allocation11_spill] sm:$0xff] }
  0x46   :  { %415 = vmatpush.msrb.mxu0 %v2852_v53  ;;  %456 = vmatpush.msrb.mxu1 %v1781_v25  ;;  %v2132_v25 = vand.u32 4294901760, %v2108_v11  ;;  %v619_v50 = vand.u32 4294901760, %v618_v4 }
  0x47   :  { %505 = vmatpush.msrb.mxu2 %v2033_v23  ;;  %147 = vmatmul.f32.vlgmr.msra.gmra.mxu0 %v2119_v17 }
  0x48   :  { %419 = vmatpush.msrb.mxu0 %v2853_v44  ;;  %458 = vmatpush.msrb.mxu1 %v1785_v28  ;;  %2854 = vst [vmem:[#allocation14_spill] sm:$0xff] %v2132_v25  ;;  %v607_v28 = vand.u32 4294901760, %v606_v22  ;;  %v153_v39 = vsub.f32 %v2108_v11, %v2132_v25  ;;  %v76_v44 = vld [vmem:[#allocation5 + $0xf0] sm:$0xff] }
  0x49   :  { %507 = vmatpush.msrb.mxu2 %v2049_v60  ;;  %602 = vmatpush.msrb.mxu3 %v601_v16 }
  0x4a   :  { %423 = vmatpush.msrb.mxu0 %v2855_v40  ;;  %460 = vmatpush.msrb.mxu1 %v1803_v35  ;;  %v613_v35 = vand.u32 4294901760, %v612_v62  ;;  %v2162_v5 = vand.u32 4294901760, %v153_v39  ;;  %v2309_v40 = vand.u32 4294901760, %v76_v44 }
  0x4b   :  { %509 = vmatpush.msrb.mxu2 %v2062_v7  ;;  %608 = vmatpush.msrb.mxu3 %v607_v28  ;;  %v72_v28 = vld [vmem:[#allocation5 + $0xd0] sm:$0xff] }
  0x4c   :  { %427 = vmatpush.msrb.mxu0 %v2856_v20  ;;  %462 = vmatpush.msrb.mxu1 %v1815_v41  ;;  %v624_v41 = vsub.f32 %v2125_v29, %v623_v26  ;;  %2858 = vst [vmem:[#allocation15_spill] sm:$0xff] %v2162_v5 }
  0x4d   :  { %511 = vmatpush.msrb.mxu2 %v2080_v9  ;;  %614 = vmatpush.msrb.mxu3 %v613_v35  ;;  %v68_v35 = vld [vmem:[#allocation5 + $0xb0] sm:$0xff] }
  0x4e   :  { %431 = vmatpush.msrb.mxu0 %v2857_v19  ;;  %464 = vmatpush.msrb.mxu1 %v1834_v51  ;;  %v625_v51 = vand.u32 4294901760, %v624_v41  ;;  %v2326_v19 = vand.u32 4294901760, %v72_v28 }
  0x4f   :  { %314 = vmatmul.f32.vlgmr.msra.gmra.mxu2 %v2047_v13  ;;  %620 = vmatpush.msrb.mxu3 %v619_v50 }
  0x50   :  { %638 = vmatpush.msra.mxu0 %v1895_v43  ;;  %466 = vmatpush.msrb.mxu1 %v1846_v57  ;;  %v2859_v57 = vand.u32 4294901760, %v1895_v43  ;;  %v2862_v43 = vand.u32 4294901760, %v1928_v38 }
  0x51   :  { %513 = vmatpush.msrb.mxu2 %v2099_v21  ;;  %155 = vmatmul.f32.gmra.mxu0 %v2162_v5 }
  0x52   :  { %641 = vmatpush.msra.mxu0 %v1907_v56  ;;  %468 = vmatpush.msrb.mxu1 %v1856_v0  ;;  %v2860_v0 = vand.u32 4294901760, %v1907_v56  ;;  %v100_v56 = vld [vmem:[#allocation5 + $0x1b0] sm:$0xff] }
  0x53   :  { %358 = vmatmul.f32.vlgmr.msra.gmra.mxu3 %v2072_v15  ;;  %743 = vmatpush.msra.mxu2 %v2859_v57 }
  0x54   :  { %644 = vmatpush.msra.mxu0 %v1928_v38  ;;  %470 = vmatpush.msrb.mxu1 %v1870_v18  ;;  %v2863_v18 = vand.u32 4294901760, %v1943_v52  ;;  %v2868_v38 = vand.u32 4294901760, %v2009_v55 }
  0x55   :  { %626 = vmatpush.msrb.mxu3 %v625_v51  ;;  %260 = vmatmul.f32.gmra.mxu1 %v2082_v3  ;;  %v64_v51 = vld [vmem:[#allocation5 + $0x90] sm:$0xff] }
  0x56   :  { %647 = vmatpush.msra.mxu0 %v1943_v52  ;;  %747 = vmatpush.msra.mxu2 %v2860_v0  ;;  %v2865_v52 = vand.u32 4294901760, %v1966_v2 }
  0x57   :  { %814 = vmatpush.msra.mxu3 %v1864_v8  ;;  %472 = vmatpush.msrb.mxu1 %v2861_v63  ;;  %v2342_v63 = vand.u32 4294901760, %v68_v35 }
  0x58   :  { %650 = vmatpush.msra.mxu0 %v1958_v33  ;;  %751 = vmatpush.msra.mxu2 %v2862_v43 }
  0x59   :  { %696 = vmatpush.msra.mxu1 %v1864_v8  ;;  %816 = vmatpush.msra.mxu3 %v1880_v31  ;;  %v2864_v8 = vand.u32 4294901760, %v1958_v33  ;;  %v2866_v33 = vand.u32 4294901760, %v1979_v42 }
  0x5a   :  { %653 = vmatpush.msra.mxu0 %v1966_v2  ;;  %755 = vmatpush.msra.mxu2 %v2863_v18  ;;  %v2246_v2 = vand.u32 4294901760, %v100_v56 }
  0x5b   :  { %698 = vmatpush.msra.mxu1 %v1880_v31  ;;  %818 = vmatpush.msra.mxu3 %v1902_v54  ;;  %v2867_v31 = vand.u32 4294901760, %v1997_v49 }
  0x5c   :  { %433 = vmatmul.f32.vlgmr.msrb.gmra.mxu0 %v2023_v30  ;;  %759 = vmatpush.msra.mxu2 %v2864_v8  ;;  %v60_v8 = vld [vmem:[#allocation5 + $0x70] sm:$0xff] }
  0x5d   :  { %700 = vmatpush.msra.mxu1 %v1902_v54  ;;  %656 = vmatpush.msra.mxu0 %v1979_v42  ;;  %v104_v54 = vld [vmem:[#allocation5 + $0x1d0] sm:$0xff] }
  0x5e   :  { %820 = vmatpush.msra.mxu3 %v1917_v12  ;;  %474 = vmatmul.f32.vlgmr.msrb.gmra.mxu1 %v2023_v30 }
  0x5f   :  { %659 = vmatpush.msra.mxu0 %v1997_v49  ;;  %702 = vmatpush.msra.mxu1 %v1917_v12  ;;  %v2871_v12 = vand.u32 4294901760, %v2060_v14 }
  0x60   :  { %763 = vmatpush.msra.mxu2 %v2865_v52  ;;  %822 = vmatpush.msra.mxu3 %v1930_v6 }
  0x61   :  { %662 = vmatpush.msra.mxu0 %v2009_v55  ;;  %704 = vmatpush.msra.mxu1 %v1930_v6  ;;  %v108_v6 = vld [vmem:[#allocation5 + $0x1f0] sm:$0xff] }
  0x62   :  { %767 = vmatpush.msra.mxu2 %v2866_v33  ;;  %824 = vmatpush.msra.mxu3 %v1935_v58  ;;  %v2225_v49 = vand.u32 4294901760, %v108_v6  ;;  %v2351_v33 = vand.u32 4294901760, %v64_v51 }
  0x63   :  { %319 = vmatmul.f32.gmra.mxu2 %v2108_v11  ;;  %665 = vmatpush.msra.mxu0 %v2021_v34 }
  0x64   :  { %706 = vmatpush.msra.mxu1 %v1935_v58  ;;  %771 = vmatpush.msra.mxu2 %v2867_v31  ;;  %v2869_v58 = vand.u32 4294901760, %v2021_v34  ;;  %v2240_v42 = vsub.f32 %v108_v6, %v2225_v49  ;;  %v2355_v6 = vsub.f32 %v72_v28, %v2326_v19 }
  0x65   :  { %826 = vmatpush.msra.mxu3 %v1950_v36  ;;  %668 = vmatpush.msra.mxu0 %v2036_v59 }
  0x66   :  { %364 = vmatmul.f32.gmra.mxu3 %v2132_v25  ;;  %708 = vmatpush.msra.mxu1 %v1950_v36  ;;  %v2870_v36 = vand.u32 4294901760, %v2036_v59  ;;  %v92_v59 = vld [vmem:[#allocation5 + $0x170] sm:$0xff]  ;;  %v905_v34 = vand.u32 4294901760, %v2240_v42 }
  0x67   :  { %775 = vmatpush.msra.mxu2 %v2868_v38  ;;  %828 = vmatpush.msra.mxu3 %v1973_v24 }
  0x68   :  { %671 = vmatpush.msra.mxu0 %v2060_v14  ;;  %710 = vmatpush.msra.mxu1 %v1973_v24  ;;  %v2234_v24 = vand.u32 4294901760, %v104_v54  ;;  %v2264_v14 = vand.u32 4294901760, %v92_v59 }
  0x69   :  { %779 = vmatpush.msra.mxu2 %v2869_v58  ;;  %830 = vmatpush.msra.mxu3 %v1986_v27 }
  0x6a   :  { %674 = vmatpush.msra.mxu0 %v2075_v48  ;;  %712 = vmatpush.msra.mxu1 %v1986_v27  ;;  %v96_v27 = vld [vmem:[#allocation5 + $0x190] sm:$0xff]  ;;  %v2254_v55 = vsub.f32 %v104_v54, %v2234_v24  ;;  %v2267_v48 = vsub.f32 %v100_v56, %v2246_v2  ;;  %v2292_v22 = vsub.f32 %v92_v59, %v2264_v14 }
  0x6b   :  { %783 = vmatpush.msra.mxu2 %v2870_v36  ;;  %832 = vmatpush.msra.mxu3 %v1999_v37  ;;  %v2364_v36 = vand.u32 4294901760, %v60_v8  ;;  %v2367_v56 = vsub.f32 %v68_v35, %v2342_v63 }
  0x6c   :  { %519 = vmatmul.f32.vlgmr.msrb.gmra.mxu2 %v2119_v17  ;;  %677 = vmatpush.msra.mxu0 %v2090_v46  ;;  %v2813_v53 = vand.u32 4294901760, %v2267_v48 }
  0x6d   :  { %714 = vmatpush.msra.mxu1 %v1999_v37  ;;  %787 = vmatpush.msra.mxu2 %v2871_v12  ;;  %v2251_v37 = vand.u32 4294901760, %v96_v27  ;;  %v56_v12 = vld [vmem:[#allocation5 + $0x50] sm:$0xff]  ;;  %v2389_v28 = vsub.f32 %v60_v8, %v2364_v36  ;;  %v105_v8 = vld [vmem:[#allocation5 + $0x1d8] sm:$0xff] }
  0x6e   :  { %834 = vmatpush.msra.mxu3 %v2011_v45  ;;  %680 = vmatpush.msra.mxu0 %v2105_v47  ;;  %v80_v47 = vld [vmem:[#allocation5 + $0x110] sm:$0xff] }
  0x6f   :  { %628 = vmatmul.f32.vlgmr.msrb.gmra.mxu3 %v2023_v30  ;;  %716 = vmatpush.msra.mxu1 %v2011_v45  ;;  %v88_v45 = vld [vmem:[#allocation5 + $0x150] sm:$0xff]  ;;  %v2274_v46 = vsub.f32 %v96_v27, %v2251_v37  ;;  %v2302_v16 = vand.u32 4294901760, %v80_v47 }
  0x70   :  { %791 = vmatpush.msra.mxu2 %v605_v32  ;;  %836 = vmatpush.msra.mxu3 %v2033_v23  ;;  %v84_v32 = vld [vmem:[#allocation5 + $0x130] sm:$0xff]  ;;  %v2281_v61 = vand.u32 4294901760, %v88_v45 }
  0x71   :  { %683 = vmatpush.msra.mxu0 %v2125_v29  ;;  %718 = vmatpush.msra.mxu1 %v2033_v23  ;;  %v2814_v23 = vand.u32 4294901760, %v2254_v55  ;;  %v2811_v29 = vand.u32 4294901760, %v2274_v46  ;;  %v2330_v50 = vsub.f32 %v80_v47, %v2302_v16  ;;  %v2384_v47 = vand.u32 4294901760, %v56_v12 }
  0x72   :  { %795 = vmatpush.msra.mxu2 %v611_v10  ;;  %838 = vmatpush.msra.mxu3 %v2049_v60  ;;  %v2288_v10 = vand.u32 4294901760, %v84_v32  ;;  %v2305_v62 = vsub.f32 %v88_v45, %v2281_v61  ;;  %v2803_v45 = vand.u32 4294901760, %v2355_v6 }
  0x73   :  { %855 = vmatpush.msrb.mxu0 %v2225_v49  ;;  %720 = vmatpush.msra.mxu1 %v2049_v60  ;;  %v906_v60 = vsub.f32 %v2240_v42, %v905_v34  ;;  %v924_v39 = vsub.f32 %v2274_v46, %v2811_v29  ;;  %v2806_v31 = vand.u32 4294901760, %v2330_v50  ;;  %2872 = vst [vmem:[#allocation11_spill] sm:$0xff] %v2384_v47 }
  0x74   :  { %799 = vmatpush.msra.mxu2 %v617_v1  ;;  %840 = vmatpush.msra.mxu3 %v2062_v7  ;;  %v2318_v20 = vsub.f32 %v84_v32, %v2288_v10  ;;  %v2809_v41 = vand.u32 4294901760, %v2305_v62  ;;  %v2377_v32 = vsub.f32 %v64_v51, %v2351_v33  ;;  %v960_v35 = vsub.f32 %v2355_v6, %v2803_v45 }
  0x75   :  { %527 = vmatmul.f32.gmra.mxu2 %v2162_v5  ;;  %857 = vmatpush.msrb.mxu0 %v2234_v24  ;;  %v907_v1 = vand.u32 4294901760, %v906_v60  ;;  %v925_v18 = vand.u32 4294901760, %v924_v39  ;;  %v948_v59 = vsub.f32 %v2330_v50, %v2806_v31 }
  0x76   :  { %722 = vmatpush.msra.mxu1 %v2062_v7  ;;  %803 = vmatpush.msra.mxu2 %v623_v26  ;;  %v912_v7 = vsub.f32 %v2254_v55, %v2814_v23  ;;  %v2810_v26 = vand.u32 4294901760, %v2292_v22  ;;  %v2808_v43 = vand.u32 4294901760, %v2318_v20  ;;  %v936_v52 = vsub.f32 %v2305_v62, %v2809_v41  ;;  %v89_v41 = vld [vmem:[#allocation5 + $0x158] sm:$0xff] }
  0x77   :  { %842 = vmatpush.msra.mxu3 %v2080_v9  ;;  %437 = vmatmul.f32.gmra.mxu0 %v2082_v3  ;;  %v949_v39 = vand.u32 4294901760, %v948_v59  ;;  %v2474_v23 = vand.u32 4294901760, %v89_v41 }
  0x78   :  { %632 = vmatmul.f32.gmra.mxu3 %v2082_v3  ;;  %859 = vmatpush.msrb.mxu0 %v2246_v2  ;;  %v913_v4 = vand.u32 4294901760, %v912_v7  ;;  %v930_v0 = vsub.f32 %v2292_v22, %v2810_v26  ;;  %v942_v54 = vsub.f32 %v2318_v20, %v2808_v43  ;;  %v937_v27 = vand.u32 4294901760, %v936_v52 }
  0x79   :  { %1010 = vmatpush.msrb.mxu2 %v2240_v42  ;;  %724 = vmatpush.msra.mxu1 %v2080_v9  ;;  %v918_v9 = vsub.f32 %v2267_v48, %v2813_v53 }
  0x7a   :  { %844 = vmatpush.msra.mxu3 %v2099_v21  ;;  %478 = vmatmul.f32.gmra.mxu1 %v2082_v3  ;;  %v931_v58 = vand.u32 4294901760, %v930_v0  ;;  %v943_v7 = vand.u32 4294901760, %v942_v54  ;;  %v2807_v54 = vand.u32 4294901760, %v2389_v28 }
  0x7b   :  { %861 = vmatpush.msrb.mxu0 %v2251_v37  ;;  %1013 = vmatpush.msrb.mxu2 %v2254_v55  ;;  %v919_v57 = vand.u32 4294901760, %v918_v9  ;;  %v48_v9 = vld [vmem:[#allocation5 + $0x10] sm:$0xff] }
  0x7c   :  { %1068 = vmatpush.msrb.mxu3 %v2225_v49  ;;  %726 = vmatpush.msra.mxu1 %v2099_v21  ;;  %v2335_v21 = vsub.f32 %v76_v44, %v2309_v40  ;;  %v52_v44 = vld [vmem:[#allocation5 + $0x30] sm:$0xff] }
  0x7d   :  { %863 = vmatpush.msrb.mxu0 %v2264_v14  ;;  %1016 = vmatpush.msrb.mxu2 %v2267_v48  ;;  %v2397_v51 = vand.u32 4294901760, %v52_v44 }
  0x7e   :  { %908 = vmatpush.msrb.mxu1 %v907_v1  ;;  %1070 = vmatpush.msrb.mxu3 %v2234_v24  ;;  %v2805_v38 = vand.u32 4294901760, %v2335_v21  ;;  %v2802_v1 = vand.u32 4294901760, %v2367_v56 }
  0x7f   :  { %805 = vmatmul.f32.vlgmr.msra.gmra.mxu2 %v2023_v30  ;;  %865 = vmatpush.msrb.mxu0 %v2281_v61  ;;  %2873 = vst [vmem:[#allocation16_spill] sm:$0xff] %v2397_v51 }
  0x80   :  { %914 = vmatpush.msrb.mxu1 %v913_v4  ;;  %1019 = vmatpush.msrb.mxu2 %v2274_v46  ;;  %v954_v60 = vsub.f32 %v2335_v21, %v2805_v38  ;;  %v109_v4 = vld [vmem:[#allocation5 + $0x1f8] sm:$0xff]  ;;  %v966_v52 = vsub.f32 %v2367_v56, %v2802_v1 }
  0x81   :  { %1072 = vmatpush.msrb.mxu3 %v2246_v2  ;;  %686 = vmatmul.f32.vlgmr.msra.gmra.mxu0 %v2047_v13  ;;  %v101_v1 = vld [vmem:[#allocation5 + $0x1b8] sm:$0xff] }
  0x82   :  { %846 = vmatmul.f32.vlgmr.msra.gmra.mxu3 %v2023_v30  ;;  %867 = vmatpush.msrb.mxu0 %v2288_v10  ;;  %v955_v0 = vand.u32 4294901760, %v954_v60  ;;  %v2421_v60 = vsub.f32 %v52_v44, %v2397_v51  ;;  %v97_v38 = vld [vmem:[#allocation5 + $0x198] sm:$0xff]  ;;  %v2440_v31 = vand.u32 4294901760, %v101_v1 }
  0x83   :  { %920 = vmatpush.msrb.mxu1 %v919_v57  ;;  %1022 = vmatpush.msrb.mxu2 %v2292_v22  ;;  %v2804_v57 = vand.u32 4294901760, %v2377_v32  ;;  %v2452_v43 = vand.u32 4294901760, %v97_v38 }
  0x84   :  { %1074 = vmatpush.msrb.mxu3 %v2251_v37  ;;  %730 = vmatmul.f32.vlgmr.msra.gmra.mxu1 %v2072_v15  ;;  %v2460_v26 = vsub.f32 %v101_v1, %v2440_v31  ;;  %v77_v15 = vld [vmem:[#allocation5 + $0xf8] sm:$0xff] }
  0x85   :  { %869 = vmatpush.msrb.mxu0 %v2302_v16  ;;  %926 = vmatpush.msrb.mxu1 %v925_v18  ;;  %v2403_v18 = vsub.f32 %v56_v12, %v2384_v47  ;;  %v961_v12 = vand.u32 4294901760, %v960_v35  ;;  %v972_v59 = vsub.f32 %v2377_v32, %v2804_v57  ;;  %v978_v35 = vsub.f32 %v2389_v28, %v2807_v54 }
  0x86   :  { %1025 = vmatpush.msrb.mxu2 %v2305_v62  ;;  %1076 = vmatpush.msrb.mxu3 %v2264_v14  ;;  %v2472_v1 = vsub.f32 %v97_v38, %v2452_v43 }
  0x87   :  { %871 = vmatpush.msrb.mxu0 %v2309_v40  ;;  %932 = vmatpush.msrb.mxu1 %v931_v58  ;;  %v2409_v58 = vand.u32 4294901760, %v48_v9  ;;  %v2812_v45 = vand.u32 4294901760, %v2403_v18 }
  0x88   :  { %1028 = vmatpush.msrb.mxu2 %v2318_v20  ;;  %1078 = vmatpush.msrb.mxu3 %v2281_v61 }
  0x89   :  { %873 = vmatpush.msrb.mxu0 %v2326_v19  ;;  %938 = vmatpush.msrb.mxu1 %v937_v27  ;;  %2874 = vst [vmem:[#allocation17_spill] sm:$0xff] %v2409_v58  ;;  %v2412_v27 = vand.u32 4294901760, %v109_v4  ;;  %v2433_v44 = vsub.f32 %v48_v9, %v2409_v58  ;;  %v93_v9 = vld [vmem:[#allocation5 + $0x178] sm:$0xff] }
  0x8a   :  { %1031 = vmatpush.msrb.mxu2 %v2330_v50  ;;  %1080 = vmatpush.msrb.mxu3 %v2288_v10  ;;  %v2462_v29 = vand.u32 4294901760, %v93_v9 }
  0x8b   :  { %875 = vmatpush.msrb.mxu0 %v2342_v63  ;;  %944 = vmatpush.msrb.mxu1 %v943_v7  ;;  %v2423_v7 = vand.u32 4294901760, %v105_v8  ;;  %v2436_v57 = vsub.f32 %v109_v4, %v2412_v27  ;;  %v984_v4 = vsub.f32 %v2403_v18, %v2812_v45  ;;  %v85_v45 = vld [vmem:[#allocation5 + $0x138] sm:$0xff] }
  0x8c   :  { %1034 = vmatpush.msrb.mxu2 %v2335_v21  ;;  %1082 = vmatpush.msrb.mxu3 %v2302_v16  ;;  %v2490_v42 = vand.u32 4294901760, %v85_v45 }
  0x8d   :  { %877 = vmatpush.msrb.mxu0 %v2351_v33  ;;  %950 = vmatpush.msrb.mxu1 %v949_v39  ;;  %v967_v39 = vand.u32 4294901760, %v966_v52  ;;  %v2815_v52 = vand.u32 4294901760, %v2421_v60  ;;  %v2445_v54 = vsub.f32 %v105_v8, %v2423_v7  ;;  %v2817_v8 = vand.u32 4294901760, %v2433_v44 }
  0x8e   :  { %1037 = vmatpush.msrb.mxu2 %v2355_v6  ;;  %1084 = vmatpush.msrb.mxu3 %v2309_v40  ;;  %v985_v53 = vand.u32 4294901760, %v984_v4  ;;  %v2488_v4 = vsub.f32 %v93_v9, %v2462_v29  ;;  %v2501_v9 = vsub.f32 %v89_v41, %v2474_v23  ;;  %v2515_v5 = vsub.f32 %v85_v45, %v2490_v42  ;;  %v69_v41 = vld [vmem:[#allocation5 + $0xb8] sm:$0xff] }
  0x8f   :  { %879 = vmatpush.msrb.mxu0 %v2364_v36  ;;  %956 = vmatpush.msrb.mxu1 %v955_v0  ;;  %v973_v0 = vand.u32 4294901760, %v972_v59  ;;  %v2816_v59 = vand.u32 4294901760, %v2436_v57 }
  0x90   :  { %1040 = vmatpush.msrb.mxu2 %v2367_v56  ;;  %1086 = vmatpush.msrb.mxu3 %v2326_v19 }
  0x91   :  { %881 = vmatpush.msrb.mxu0 %v2384_v47  ;;  %962 = vmatpush.msrb.mxu1 %v961_v12  ;;  %v979_v12 = vand.u32 4294901760, %v978_v35  ;;  %v81_v35 = vld [vmem:[#allocation5 + $0x118] sm:$0xff] }
  0x92   :  { %1043 = vmatpush.msrb.mxu2 %v2377_v32  ;;  %1088 = vmatpush.msrb.mxu3 %v2342_v63 }
  0x93   :  { %883 = vmatpush.msrb.mxu0 %v2397_v51  ;;  %968 = vmatpush.msrb.mxu1 %v967_v39  ;;  %v990_v39 = vsub.f32 %v2421_v60, %v2815_v52  ;;  %v996_v52 = vsub.f32 %v2433_v44, %v2817_v8 }
  0x94   :  { %1046 = vmatpush.msrb.mxu2 %v2389_v28  ;;  %1090 = vmatpush.msrb.mxu3 %v2351_v33 }
  0x95   :  { %885 = vmatpush.msrb.mxu0 %v2409_v58  ;;  %974 = vmatpush.msrb.mxu1 %v973_v0  ;;  %v1278_v0 = vsub.f32 %v2436_v57, %v2816_v59  ;;  %v2876_v59 = vand.u32 4294901760, %v2445_v54 }
  0x96   :  { %1049 = vmatpush.msrb.mxu2 %v2403_v18  ;;  %1092 = vmatpush.msrb.mxu3 %v2364_v36 }
  0x97   :  { %1115 = vmatpush.msra.mxu0 %v905_v34  ;;  %980 = vmatpush.msrb.mxu1 %v979_v12  ;;  %v2875_v34 = vand.u32 4294901760, %v2254_v55  ;;  %v991_v12 = vand.u32 4294901760, %v990_v39  ;;  %v1284_v8 = vsub.f32 %v2445_v54, %v2876_v59  ;;  %v1279_v55 = vand.u32 4294901760, %v1278_v0 }
  0x98   :  { %1052 = vmatpush.msrb.mxu2 %v2421_v60  ;;  %1094 = vmatpush.msrb.mxu3 %v2384_v47  ;;  %v2503_v47 = vand.u32 4294901760, %v81_v35  ;;  %v997_v39 = vand.u32 4294901760, %v996_v52  ;;  %v2878_v59 = vand.u32 4294901760, %v2460_v26 }
  0x99   :  { %809 = vmatmul.f32.gmra.mxu2 %v2082_v3  ;;  %1119 = vmatpush.msra.mxu0 %v2875_v34  ;;  %v73_v34 = vld [vmem:[#allocation5 + $0xd8] sm:$0xff]  ;;  %v1285_v52 = vand.u32 4294901760, %v1284_v8 }
  0x9a   :  { %986 = vmatpush.msrb.mxu1 %v985_v53  ;;  %1055 = vmatpush.msrb.mxu2 %v2433_v44  ;;  %v2877_v53 = vand.u32 4294901760, %v2267_v48  ;;  %v1290_v38 = vsub.f32 %v2460_v26, %v2878_v59  ;;  %v2879_v48 = vand.u32 4294901760, %v2472_v1  ;;  %v2527_v59 = vsub.f32 %v81_v35, %v2503_v47 }
  0x9b   :  { %1096 = vmatpush.msrb.mxu3 %v2397_v51  ;;  %691 = vmatmul.f32.gmra.mxu0 %v2108_v11  ;;  %v2517_v51 = vand.u32 4294901760, %v77_v15  ;;  %v2529_v45 = vand.u32 4294901760, %v73_v34  ;;  %v2880_v11 = vand.u32 4294901760, %v2274_v46 }
  0x9c   :  { %850 = vmatmul.f32.gmra.mxu3 %v2082_v3  ;;  %1123 = vmatpush.msra.mxu0 %v2877_v53  ;;  %v1296_v0 = vsub.f32 %v2472_v1, %v2879_v48  ;;  %v1291_v8 = vand.u32 4294901760, %v1290_v38  ;;  %v1313_v53 = vand.u32 4294901760, %v2515_v5  ;;  %v2883_v38 = vand.u32 4294901760, %v2501_v9 }
  0x9d   :  { %1227 = vmatpush.msra.mxu2 %v2412_v27  ;;  %992 = vmatpush.msrb.mxu1 %v991_v12  ;;  %v2881_v12 = vand.u32 4294901760, %v2488_v4  ;;  %v2539_v35 = vsub.f32 %v77_v15, %v2517_v51  ;;  %v2552_v15 = vsub.f32 %v73_v34, %v2529_v45  ;;  %v2885_v34 = vand.u32 4294901760, %v2318_v20 }
  0x9e   :  { %1098 = vmatpush.msrb.mxu3 %v2409_v58  ;;  %736 = vmatmul.f32.gmra.mxu1 %v2132_v25  ;;  %v65_v25 = vld [vmem:[#allocation5 + $0x98] sm:$0xff]  ;;  %v2882_v58 = vand.u32 4294901760, %v2292_v22  ;;  %v1297_v46 = vand.u32 4294901760, %v1296_v0  ;;  %v2884_v22 = vand.u32 4294901760, %v2305_v62  ;;  %v2886_v20 = vand.u32 4294901760, %v2330_v50 }
  0x9f   :  { %1127 = vmatpush.msra.mxu0 %v2880_v11  ;;  %1229 = vmatpush.msra.mxu2 %v2423_v7  ;;  %v1302_v48 = vsub.f32 %v2488_v4, %v2881_v12  ;;  %v2544_v11 = vand.u32 4294901760, %v69_v41  ;;  %v61_v12 = vld [vmem:[#allocation5 + $0x78] sm:$0xff]  ;;  %v1325_v0 = vand.u32 4294901760, %v2539_v35 }
  0xa0   :  { %1280 = vmatpush.msra.mxu3 %v1279_v55  ;;  %998 = vmatpush.msrb.mxu1 %v997_v39  ;;  %v1308_v55 = vsub.f32 %v2501_v9, %v2883_v38  ;;  %v2829_v39 = vand.u32 4294901760, %v2527_v59  ;;  %v57_v38 = vld [vmem:[#allocation5 + $0x58] sm:$0xff] }
  0xa1   :  { %1131 = vmatpush.msra.mxu0 %v2882_v58  ;;  %1231 = vmatpush.msra.mxu2 %v2440_v31  ;;  %v1303_v58 = vand.u32 4294901760, %v1302_v48  ;;  %v2568_v62 = vsub.f32 %v69_v41, %v2544_v11 }
  0xa2   :  { %1186 = vmatpush.msra.mxu1 %v2225_v49  ;;  %1286 = vmatpush.msra.mxu3 %v1285_v52  ;;  %v2557_v49 = vand.u32 4294901760, %v65_v25  ;;  %v1314_v52 = vsub.f32 %v2515_v5, %v1313_v53  ;;  %v1320_v48 = vsub.f32 %v2527_v59, %v2829_v39  ;;  %v2887_v39 = vand.u32 4294901760, %v2335_v21 }
  0xa3   :  { %1135 = vmatpush.msra.mxu0 %v2884_v22  ;;  %1233 = vmatpush.msra.mxu2 %v2452_v43  ;;  %v1331_v22 = vand.u32 4294901760, %v2552_v15 }
  0xa4   :  { %1188 = vmatpush.msra.mxu1 %v2234_v24  ;;  %1292 = vmatpush.msra.mxu3 %v1291_v8  ;;  %v2570_v24 = vand.u32 4294901760, %v61_v12  ;;  %v1309_v8 = vand.u32 4294901760, %v1308_v55  ;;  %v1315_v41 = vand.u32 4294901760, %v1314_v52  ;;  %v2587_v55 = vand.u32 4294901760, %v57_v38  ;;  %v49_v52 = vld [vmem:[#allocation5 + $0x18] sm:$0xff] }
  0xa5   :  { %1139 = vmatpush.msra.mxu0 %v2885_v34  ;;  %1235 = vmatpush.msra.mxu2 %v2462_v29  ;;  %v53_v34 = vld [vmem:[#allocation5 + $0x38] sm:$0xff]  ;;  %v1321_v50 = vand.u32 4294901760, %v1320_v48  ;;  %v2617_v48 = vand.u32 4294901760, %v49_v52 }
  0xa6   :  { %1190 = vmatpush.msra.mxu1 %v2246_v2  ;;  %1298 = vmatpush.msra.mxu3 %v1297_v46  ;;  %v2581_v2 = vsub.f32 %v65_v25, %v2557_v49  ;;  %v1326_v46 = vsub.f32 %v2539_v35, %v1325_v0  ;;  %v2594_v25 = vsub.f32 %v61_v12, %v2570_v24  ;;  %v2604_v21 = vand.u32 4294901760, %v53_v34 }
  0xa7   :  { %1143 = vmatpush.msra.mxu0 %v2886_v20  ;;  %1237 = vmatpush.msra.mxu2 %v2474_v23  ;;  %v2888_v20 = vand.u32 4294901760, %v2355_v6  ;;  %v2608_v12 = vsub.f32 %v57_v38, %v2587_v55  ;;  %v2890_v38 = vand.u32 4294901760, %v2377_v32 }
  0xa8   :  { %1192 = vmatpush.msra.mxu1 %v2251_v37  ;;  %1304 = vmatpush.msra.mxu3 %v1303_v58  ;;  %v1337_v37 = vand.u32 4294901760, %v2568_v62  ;;  %v1332_v58 = vsub.f32 %v2552_v15, %v1331_v22  ;;  %v1349_v6 = vand.u32 4294901760, %v2594_v25 }
  0xa9   :  { %1147 = vmatpush.msra.mxu0 %v2887_v39  ;;  %1239 = vmatpush.msra.mxu2 %v2490_v42  ;;  %v1327_v39 = vand.u32 4294901760, %v1326_v46  ;;  %v1355_v46 = vand.u32 4294901760, %v2608_v12 }
  0xaa   :  { %1194 = vmatpush.msra.mxu1 %v2264_v14  ;;  %1310 = vmatpush.msra.mxu3 %v1309_v8  ;;  %v1343_v14 = vand.u32 4294901760, %v2581_v2  ;;  %v2889_v8 = vand.u32 4294901760, %v2367_v56  ;;  %v2627_v56 = vsub.f32 %v53_v34, %v2604_v21 }
  0xab   :  { %1151 = vmatpush.msra.mxu0 %v2888_v20  ;;  %1241 = vmatpush.msra.mxu2 %v2503_v47 }
  0xac   :  { %1196 = vmatpush.msra.mxu1 %v2281_v61  ;;  %1316 = vmatpush.msra.mxu3 %v1315_v41  ;;  %v1338_v61 = vsub.f32 %v2568_v62, %v1337_v37  ;;  %v1333_v41 = vand.u32 4294901760, %v1332_v58  ;;  %v2638_v58 = vsub.f32 %v49_v52, %v2617_v48  ;;  %v1356_v52 = vsub.f32 %v2608_v12, %v1355_v46 }
  0xad   :  { %1155 = vmatpush.msra.mxu0 %v2889_v8  ;;  %1243 = vmatpush.msra.mxu2 %v2517_v51  ;;  %v2894_v8 = vand.u32 4294901760, %v2433_v44  ;;  %v2896_v44 = vld [vmem:[#allocation12_spill] sm:$0xff] }
  0xae   :  { %1198 = vmatpush.msra.mxu1 %v2288_v10  ;;  %1322 = vmatpush.msra.mxu3 %v1321_v50  ;;  %v1344_v10 = vsub.f32 %v2581_v2, %v1343_v14  ;;  %v2891_v50 = vand.u32 4294901760, %v2389_v28  ;;  %v1339_v32 = vand.u32 4294901760, %v1338_v61  ;;  %v1361_v28 = vand.u32 4294901760, %v2627_v56 }
  0xaf   :  { %1159 = vmatpush.msra.mxu0 %v2890_v38  ;;  %1245 = vmatpush.msra.mxu2 %v2529_v45  ;;  %v1357_v61 = vand.u32 4294901760, %v1356_v52  ;;  %v2897_v38 = vld [vmem:[#allocation11_spill] sm:$0xff] }
  0xb0   :  { %1200 = vmatpush.msra.mxu1 %v2302_v16  ;;  %1328 = vmatpush.msra.mxu3 %v1327_v39  ;;  %v1350_v16 = vsub.f32 %v2594_v25, %v1349_v6  ;;  %v1345_v34 = vand.u32 4294901760, %v1344_v10  ;;  %v1367_v39 = vand.u32 4294901760, %v2638_v58  ;;  %v2899_v10 = vld [vmem:[#allocation16_spill] sm:$0xff] }
  0xb1   :  { %1163 = vmatpush.msra.mxu0 %v2891_v50  ;;  %1247 = vmatpush.msra.mxu2 %v2544_v11  ;;  %v2900_v50 = vand.u32 4294901760, %v2445_v54 }
  0xb2   :  { %1202 = vmatpush.msra.mxu1 %v2309_v40  ;;  %1334 = vmatpush.msra.mxu3 %v1333_v41  ;;  %v2892_v40 = vand.u32 4294901760, %v2403_v18  ;;  %v1351_v20 = vand.u32 4294901760, %v1350_v16  ;;  %v1362_v18 = vsub.f32 %v2627_v56, %v1361_v28  ;;  %v2903_v16 = vld [vmem:[#allocation13_spill] sm:$0xff] }
  0xb3   :  { %891 = vmatmul.f32.vlgmr.msrb.gmra.mxu0 %v2119_v17  ;;  %1249 = vmatpush.msra.mxu2 %v2557_v49 }
  0xb4   :  { %1204 = vmatpush.msra.mxu1 %v2326_v19  ;;  %1167 = vmatpush.msra.mxu0 %v2892_v40  ;;  %v2893_v19 = vand.u32 4294901760, %v2421_v60  ;;  %v1363_v60 = vand.u32 4294901760, %v1362_v18  ;;  %v2905_v40 = vld [vmem:[#allocation14_spill] sm:$0xff] }
  0xb5   :  { %1340 = vmatpush.msra.mxu3 %v1339_v32  ;;  %1000 = vmatmul.f32.vlgmr.msrb.gmra.mxu1 %v2023_v30  ;;  %v2901_v32 = vld [vmem:[#allocation17_spill] sm:$0xff] }
  0xb6   :  { %1171 = vmatpush.msra.mxu0 %v2893_v19  ;;  %1206 = vmatpush.msra.mxu1 %v2342_v63  ;;  %v1368_v63 = vsub.f32 %v2638_v58, %v1367_v39 }
  0xb7   :  { %1251 = vmatpush.msra.mxu2 %v2570_v24  ;;  %1346 = vmatpush.msra.mxu3 %v1345_v34 }
  0xb8   :  { %1175 = vmatpush.msra.mxu0 %v2894_v8  ;;  %1208 = vmatpush.msra.mxu1 %v2351_v33  ;;  %v2895_v33 = vld [vmem:[#allocation15_spill] sm:$0xff]  ;;  %v1369_v41 = vand.u32 4294901760, %v1368_v63 }
  0xb9   :  { %1253 = vmatpush.msra.mxu2 %v2587_v55  ;;  %1352 = vmatpush.msra.mxu3 %v1351_v20 }
  0xba   :  { %1382 = vmatpush.msrb.mxu0 %v2436_v57  ;;  %1058 = vmatmul.f32.vlgmr.msrb.gmra.mxu2 %v2047_v13 }
  0xbb   :  { %1210 = vmatpush.msra.mxu1 %v2364_v36  ;;  %1255 = vmatpush.msra.mxu2 %v2604_v21  ;;  %v2898_v36 = vand.u32 4294901760, %v2436_v57  ;;  %v2902_v57 = vand.u32 4294901760, %v2460_v26 }
  0xbc   :  { %1358 = vmatpush.msra.mxu3 %v1357_v61  ;;  %1385 = vmatpush.msrb.mxu0 %v2445_v54  ;;  %v2904_v54 = vand.u32 4294901760, %v2472_v1 }
  0xbd   :  { %899 = vmatmul.f32.gmra.mxu0 %v2895_v33  ;;  %1102 = vmatmul.f32.vlgmr.msrb.gmra.mxu3 %v2896_v44 }
  0xbe   :  { %1212 = vmatpush.msra.mxu1 %v2897_v38  ;;  %1257 = vmatpush.msra.mxu2 %v2617_v48 }
  0xbf   :  { %1364 = vmatpush.msra.mxu3 %v1363_v60  ;;  %1388 = vmatpush.msrb.mxu0 %v2460_v26  ;;  %v2906_v26 = vand.u32 4294901760, %v2488_v4 }
  0xc0   :  { %1487 = vmatpush.msrb.mxu2 %v2898_v36  ;;  %1004 = vmatmul.f32.gmra.mxu1 %v2082_v3 }
  0xc1   :  { %1214 = vmatpush.msra.mxu1 %v2899_v10  ;;  %1370 = vmatpush.msra.mxu3 %v1369_v41 }
  0xc2   :  { %1391 = vmatpush.msrb.mxu0 %v2472_v1  ;;  %1491 = vmatpush.msrb.mxu2 %v2900_v50  ;;  %v2908_v1 = vand.u32 4294901760, %v2527_v59 }
  0xc3   :  { %1558 = vmatpush.msrb.mxu3 %v2412_v27  ;;  %1216 = vmatpush.msra.mxu1 %v2901_v32 }
  0xc4   :  { %1394 = vmatpush.msrb.mxu0 %v2488_v4  ;;  %1495 = vmatpush.msrb.mxu2 %v2902_v57  ;;  %v148_v34 = vpop.f32.mrf.mxu0 }
  0xc5   :  { %1440 = vmatpush.msrb.mxu1 %v2412_v27  ;;  %1560 = vmatpush.msrb.mxu3 %v2423_v7  ;;  %v257_v27 = vpop.f32.mrf.mxu1 }
  0xc6   :  { %1063 = vmatmul.f32.gmra.mxu2 %v2903_v16  ;;  %1397 = vmatpush.msrb.mxu0 %v2501_v9 }
  0xc7   :  { %1442 = vmatpush.msrb.mxu1 %v2423_v7  ;;  %1499 = vmatpush.msrb.mxu2 %v2904_v54  ;;  %v2907_v7 = vand.u32 4294901760, %v2501_v9 }
  0xc8   :  { %1562 = vmatpush.msrb.mxu3 %v2440_v31  ;;  %1177 = vmatmul.f32.vlgmr.msra.gmra.mxu0 %v2023_v30 }
  0xc9   :  { %1108 = vmatmul.f32.gmra.mxu3 %v2905_v40  ;;  %1400 = vmatpush.msrb.mxu0 %v2515_v5 }
  0xca   :  { %1444 = vmatpush.msrb.mxu1 %v2440_v31  ;;  %1503 = vmatpush.msrb.mxu2 %v2906_v26 }
  0xcb   :  { %1564 = vmatpush.msrb.mxu3 %v2452_v43  ;;  %1218 = vmatmul.f32.vlgmr.msra.gmra.mxu1 %v2023_v30 }
  0xcc   :  { %1403 = vmatpush.msrb.mxu0 %v2527_v59  ;;  %1446 = vmatpush.msrb.mxu1 %v2452_v43  ;;  %v258_v43 = vadd.f32 %v257_v27, %v148_v34 }
  0xcd   :  { %1507 = vmatpush.msrb.mxu2 %v2907_v7  ;;  %1566 = vmatpush.msrb.mxu3 %v2462_v29 }
  0xce   :  { %1406 = vmatpush.msrb.mxu0 %v2539_v35  ;;  %1448 = vmatpush.msrb.mxu1 %v2462_v29  ;;  %v156_v31 = vpop.f32.mrf.mxu0 }
  0xcf   :  { %1511 = vmatpush.msrb.mxu2 %v1313_v53  ;;  %1568 = vmatpush.msrb.mxu3 %v2474_v23 }
  0xd0   :  { %1409 = vmatpush.msrb.mxu0 %v2552_v15  ;;  %1450 = vmatpush.msrb.mxu1 %v2474_v23 }
  0xd1   :  { %1515 = vmatpush.msrb.mxu2 %v2908_v1  ;;  %1570 = vmatpush.msrb.mxu3 %v2490_v42 }
  0xd2   :  { %1181 = vmatmul.f32.gmra.mxu0 %v2082_v3  ;;  %1263 = vmatmul.f32.vlgmr.msra.gmra.mxu2 %v2119_v17  ;;  %v261_v29 = vpop.f32.mrf.mxu1  ;;  %v315_v5 = vpop.f32.mrf.mxu2 }
  0xd3   :  { %1372 = vmatmul.f32.vlgmr.msra.gmra.mxu3 %v2023_v30  ;;  %1412 = vmatpush.msrb.mxu0 %v2568_v62  ;;  %v316_v23 = vadd.f32 %v315_v5, %v258_v43  ;;  %v262_v53 = vadd.f32 %v261_v29, %v156_v31 }
  0xd4   :  { %1452 = vmatpush.msrb.mxu1 %v2490_v42  ;;  %1519 = vmatpush.msrb.mxu2 %v1325_v0 }
  0xd5   :  { %1572 = vmatpush.msrb.mxu3 %v2503_v47  ;;  %1222 = vmatmul.f32.gmra.mxu1 %v2082_v3 }
  0xd6   :  { %1415 = vmatpush.msrb.mxu0 %v2581_v2  ;;  %1454 = vmatpush.msrb.mxu1 %v2503_v47  ;;  %v359_v17 = vpop.f32.mrf.mxu3 }
  0xd7   :  { %1523 = vmatpush.msrb.mxu2 %v1331_v22  ;;  %1574 = vmatpush.msrb.mxu3 %v2517_v51  ;;  %v360_v4 = vadd.f32 %v359_v17, %v316_v23 }
  0xd8   :  { %1418 = vmatpush.msrb.mxu0 %v2594_v25  ;;  %1456 = vmatpush.msrb.mxu1 %v2517_v51 }
  0xd9   :  { %1527 = vmatpush.msrb.mxu2 %v1337_v37  ;;  %1576 = vmatpush.msrb.mxu3 %v2529_v45  ;;  %v434_v42 = vpop.f32.mrf.mxu0 }
  0xda   :  { %1421 = vmatpush.msrb.mxu0 %v2608_v12  ;;  %1458 = vmatpush.msrb.mxu1 %v2529_v45  ;;  %v435_v47 = vadd.f32 %v434_v42, %v360_v4 }
  0xdb   :  { %1531 = vmatpush.msrb.mxu2 %v1343_v14  ;;  %1578 = vmatpush.msrb.mxu3 %v2544_v11  ;;  %v475_v9 = vpop.f32.mrf.mxu1 }
  0xdc   :  { %1271 = vmatmul.f32.gmra.mxu2 %v2895_v33  ;;  %1376 = vmatmul.f32.gmra.mxu3 %v2082_v3  ;;  %v476_v51 = vadd.f32 %v475_v9, %v435_v47 }
  0xdd   :  { %1424 = vmatpush.msrb.mxu0 %v2627_v56  ;;  %1460 = vmatpush.msrb.mxu1 %v2544_v11 }
  0xde   :  { %1535 = vmatpush.msrb.mxu2 %v1349_v6  ;;  %1580 = vmatpush.msrb.mxu3 %v2557_v49  ;;  %1598 = vst [vmem:[#allocation7] sm:$0xff] %v476_v51 }
  0xdf   :  { %1427 = vmatpush.msrb.mxu0 %v2638_v58  ;;  %1462 = vmatpush.msrb.mxu1 %v2557_v49 }
  0xe0   :  { %1539 = vmatpush.msrb.mxu2 %v1355_v46  ;;  %1582 = vmatpush.msrb.mxu3 %v2570_v24 }
  0xe1   :  { %1430 = vmatmul.f32.vlgmr.msrb.gmra.mxu0 %v2047_v13  ;;  %1464 = vmatpush.msrb.mxu1 %v2570_v24 }
  0xe2   :  { %1543 = vmatpush.msrb.mxu2 %v1361_v28  ;;  %1584 = vmatpush.msrb.mxu3 %v2587_v55 }
  0xe3   :  { %1466 = vmatpush.msrb.mxu1 %v2587_v55 }
  0xe4   :  { %1547 = vmatpush.msrb.mxu2 %v1367_v39  ;;  %1586 = vmatpush.msrb.mxu3 %v2604_v21 }
  0xe5   :  { %1549 = vmatmul.f32.vlgmr.msrb.gmra.mxu2 %v2023_v30  ;;  %1468 = vmatpush.msrb.mxu1 %v2604_v21 }
  0xe6   :  { %1588 = vmatpush.msrb.mxu3 %v2617_v48  ;;  %v320_v13 = vpop.f32.mrf.mxu2 }
  0xe7   :  { %1590 = vmatmul.f32.vlgmr.msrb.gmra.mxu3 %v2023_v30  ;;  %1470 = vmatpush.msrb.mxu1 %v2617_v48  ;;  %v321_v45 = vadd.f32 %v320_v13, %v262_v53 }
  0xe8   :  { %1474 = vmatmul.f32.vlgmr.msrb.gmra.mxu1 %v2896_v44 }
  0xe9   :  { %1435 = vmatmul.f32.gmra.mxu0 %v2903_v16  ;;  %v365_v59 = vpop.f32.mrf.mxu3 }
  0xea   :  { %v366_v11 = vadd.f32 %v365_v59, %v321_v45 }
  0xed   :  { %1553 = vmatmul.f32.gmra.mxu2 %v2082_v3 }
  0xef   :  { %1594 = vmatmul.f32.gmra.mxu3 %v2082_v3  ;;  %v520_v35 = vpop.f32.mrf.mxu2 }
  0xf0   :  { %1480 = vmatmul.f32.gmra.mxu1 %v2905_v40 }
  0xf2   :  { %v629_v15 = vpop.f32.mrf.mxu3 }
  0xf3   :  { %v630_v22 = vadd.f32 %v629_v15, %v520_v35 }
  0xf4   :  { %v438_v49 = vpop.f32.mrf.mxu0 }
  0xf5   :  { %v439_v30 = vadd.f32 %v438_v49, %v366_v11 }
  0xf7   :  { %v479_v0 = vpop.f32.mrf.mxu1 }
  0xf8   :  { %v480_v62 = vadd.f32 %v479_v0, %v439_v30  ;;  %v528_v24 = vpop.f32.mrf.mxu2 }
  0xfa   :  { %1602 = vst [vmem:[#allocation7 + $0x20] sm:$0xff] %v480_v62 }
  0xfb   :  { %v633_v2 = vpop.f32.mrf.mxu3 }
  0xfc   :  { %v634_v48 = vadd.f32 %v633_v2, %v528_v24 }
  0xfe   :  { %v687_v55 = vpop.f32.mrf.mxu0 }
  0xff   :  { %v688_v37 = vadd.f32 %v687_v55, %v630_v22 }
 0x101   :  { %v731_v25 = vpop.f32.mrf.mxu1 }
 0x102   :  { %v732_v14 = vadd.f32 %v731_v25, %v688_v37  ;;  %v806_v21 = vpop.f32.mrf.mxu2 }
 0x104   :  { %v807_v12 = vadd.f32 %v806_v21, %v732_v14 }
 0x105   :  { %v847_v3 = vpop.f32.mrf.mxu3 }
 0x106   :  { %v848_v6 = vadd.f32 %v847_v3, %v807_v12 }
 0x108   :  { %1599 = vst [vmem:[#allocation7 + $0x8] sm:$0xff] %v848_v6 }
 0x118   :  { %v692_v56 = vpop.f32.mrf.mxu0 }
 0x119   :  { %v693_v46 = vadd.f32 %v692_v56, %v634_v48 }
 0x11b   :  { %v737_v58 = vpop.f32.mrf.mxu1 }
 0x11c   :  { %v738_v28 = vadd.f32 %v737_v58, %v693_v46  ;;  %v810_v52 = vpop.f32.mrf.mxu2 }
 0x11e   :  { %v811_v20 = vadd.f32 %v810_v52, %v738_v28 }
 0x11f   :  { %v851_v39 = vpop.f32.mrf.mxu3 }
 0x120   :  { %v852_v19 = vadd.f32 %v851_v39, %v811_v20 }
 0x122   :  { %1603 = vst [vmem:[#allocation7 + $0x28] sm:$0xff] %v852_v19 }
 0x130   :  { %v892_v18 = vpop.f32.mrf.mxu0 }
 0x132   :  { %v1001_v8 = vpop.f32.mrf.mxu1 }
 0x133   :  { %v1002_v61 = vadd.f32 %v1001_v8, %v892_v18 }
 0x13a   :  { %v900_v63 = vpop.f32.mrf.mxu0 }
 0x13d   :  { %v1059_v60 = vpop.f32.mrf.mxu2  ;;  %v1005_v33 = vpop.f32.mrf.mxu1 }
 0x13e   :  { %v1060_v44 = vadd.f32 %v1059_v60, %v1002_v61  ;;  %v1006_v10 = vadd.f32 %v1005_v33, %v900_v63 }
 0x140   :  { %v1103_v41 = vpop.f32.mrf.mxu3 }
 0x141   :  { %v1104_v38 = vadd.f32 %v1103_v41, %v1060_v44 }
 0x145   :  { %v1178_v36 = vpop.f32.mrf.mxu0 }
 0x146   :  { %v1179_v50 = vadd.f32 %v1178_v36, %v1104_v38 }
 0x148   :  { %v1219_v32 = vpop.f32.mrf.mxu1 }
 0x149   :  { %v1220_v57 = vadd.f32 %v1219_v32, %v1179_v50  ;;  %v1064_v16 = vpop.f32.mrf.mxu2 }
 0x14a   :  { %v1065_v34 = vadd.f32 %v1064_v16, %v1006_v10 }
 0x14b   :  { %1600 = vst [vmem:[#allocation7 + $0x10] sm:$0xff] %v1220_v57 }
 0x14c   :  { %v1109_v54 = vpop.f32.mrf.mxu3 }
 0x14d   :  { %v1110_v27 = vadd.f32 %v1109_v54, %v1065_v34 }
 0x14f   :  { %v1182_v40 = vpop.f32.mrf.mxu0 }
 0x150   :  { %v1183_v26 = vadd.f32 %v1182_v40, %v1110_v27 }
 0x152   :  { %v1223_v7 = vpop.f32.mrf.mxu1 }
 0x153   :  { %v1224_v31 = vadd.f32 %v1223_v7, %v1183_v26 }
 0x155   :  { %1604 = vst [vmem:[#allocation7 + $0x30] sm:$0xff] %v1224_v31  ;;  %v1264_v43 = vpop.f32.mrf.mxu2 }
 0x156   :  { %v1373_v1 = vpop.f32.mrf.mxu3 }
 0x157   :  { %v1374_v23 = vadd.f32 %v1373_v1, %v1264_v43 }
 0x15e   :  { %v1431_v29 = vpop.f32.mrf.mxu0 }
 0x15f   :  { %v1272_v5 = vpop.f32.mrf.mxu2  ;;  %v1377_v17 = vpop.f32.mrf.mxu3  ;;  %v1432_v4 = vadd.f32 %v1431_v29, %v1374_v23 }
 0x160   :  { %v1378_v53 = vadd.f32 %v1377_v17, %v1272_v5 }
 0x165   :  { %v1475_v42 = vpop.f32.mrf.mxu1 }
 0x166   :  { %v1476_v47 = vadd.f32 %v1475_v42, %v1432_v4  ;;  %v1436_v51 = vpop.f32.mrf.mxu0 }
 0x167   :  { %v1437_v35 = vadd.f32 %v1436_v51, %v1378_v53 }
 0x168   :  { %v1550_v9 = vpop.f32.mrf.mxu2 }
 0x169   :  { %v1551_v13 = vadd.f32 %v1550_v9, %v1476_v47 }
 0x16a   :  { %v1591_v59 = vpop.f32.mrf.mxu3 }
 0x16b   :  { %v1592_v45 = vadd.f32 %v1591_v59, %v1551_v13 }
 0x16d   :  { %1601 = vst [vmem:[#allocation7 + $0x18] sm:$0xff] %v1592_v45  ;;  %v1481_v11 = vpop.f32.mrf.mxu1 }
 0x16e   :  { %v1482_v15 = vadd.f32 %v1481_v11, %v1437_v35 }
 0x170   :  { %v1554_v49 = vpop.f32.mrf.mxu2 }
 0x171   :  { %v1555_v30 = vadd.f32 %v1554_v49, %v1482_v15 }
 0x172   :  { %v1595_v0 = vpop.f32.mrf.mxu3 }
 0x173   :  { %v1596_v62 = vadd.f32 %v1595_v0, %v1555_v30 }
 0x175   :  { %1605 = vst [vmem:[#allocation7 + $0x38] sm:$0xff] %v1596_v62 }
 0x176   :  { %1618 = dma.vmem_to_hbm [thread:$0]  %s1611_s1, 1024, %s1613_s25, [#allocation4], %s1715_s21, %s1715_s21, %s1716_s22  }
 0x177   :  { %1709 = dma.done.wait [#allocation4], 1024  }
 0x178   :  { %1710 = vsyncadd [#allocation4], 4294966272 }
 0x179   :  { %1623 = vsyncpa [#allocation3], 1 }
 0x17a   :  { %1624 = vsyncpa [#allocation6], 1 }
 0x17b   :  { %1625 = vsyncpa [#allocation4], 1 }

// kernel: tpu_custom_call.1
= control target key start
LH: loop header
LB: loop body
LE: loop exit
PB: predicated region body
PF: predicated region fallthrough
CT: control target
= control target key end

     0   :  { %6 = vsyncpa [#allocation3], 0  ;;  %s3229_s0 = inlined_call_operand.hbm [shape: f32[8,16,16], index: 0, kind: input, shape index: {}]   ;;  %s3230_s1 = inlined_call_operand.hbm [shape: f32[8,16,64], index: 1, kind: output, shape index: {}]  }
   0x1   :  { %8 = vsyncpa [#allocation3 + $0x1], 0 }
   0x2   :  { %9 = vsyncpa [#allocation4], 0 }
   0x3   :  { %11 = vsyncpa [#allocation4 + $0x1], 0  ;;  %s2202_s6 = smov 0   ;;  %s2204_s7 = smov 0  }
   0x4   :  { %s2206_s8 = smov 0   ;;  %s2208_s9 = smov 0  }
   0x5   :  { %s2210_s10 = smov 0   ;;  %s2212_s11 = smov 0  }
   0x6 LB: > { %s1924_s12 = sadd.s32 4294967295, %s2169_s11   ;;  %s1925_s13 = sadd.s32 4294967294, %s2169_s11   ;;  %s2169_s11 = sphi %s2212_s11, %s17_s11   ;;  %s2165_s10 = sphi %s2210_s10, %s3261_s10   ;;  %s2161_s9 = sphi %s2208_s9, %s3260_s9   ;;  %s2157_s8 = sphi %s2206_s8, %s3259_s8   ;;  %s2153_s7 = sphi %s2204_s7, %s3258_s7   ;;  %s2149_s6 = sphi %s2202_s6, %s3257_s6  }
   0x7   : > { %s29_s14 = sadd.s32 1, %s2165_s10  ;;  %s38_s15 = sadd.s32 1, %s2157_s8 }
   0x8   : > { %p31_p0 = scmp.ge.s32.totalorder %s29_s14, 4  ;;  %p45_p1 = scmp.ne.s32.totalorder %s2157_s8, %s2153_s7 }
   0x9   : > { %p46_p2 = scmp.eq.s32.totalorder %s2169_s11, 0  ;;  %p51_p3 = scmp.ne.s32.totalorder %s2153_s7, %s2149_s6 }
   0xa   : > { %s3263_s14 = smov (%p31_p0, %s29_s14), 0  ;;  %p52_p5 = scmp.eq.s32.totalorder %s1924_s12, 0 }
   0xb   : > { %p2243_p4 = por %p46_p2, %p45_p1  ;;  %s33_s17 = ssub.s32 %s2165_s10, %s3263_s14 }
   0xc   : > { %p77_p6 = scmp.eq.s32.totalorder %s1924_s12, 3  ;;  %p36_p7 = scmp.eq.s32.totalorder %s33_s17, 0 }
   0xd   : > { %p2249_p8 = por %p52_p5, %p51_p3  ;;  %p83_p10 = scmp.eq.s32.totalorder %s1925_s13, 3 }
   0xe   : > { %p2253_p9 = por %p77_p6, %p45_p1  ;;  %p1957_p12 = scmp.lt.s32.totalorder %s2169_s11, 4 }
   0xf   : > { %s2258_s20 = scalar_select %p36_p7, %s2157_s8, %s38_s15  }
  0x10   : > { %p2260_p11 = por %p83_p10, %p51_p3  ;;  %s103_s22 = sand.u32 1, %s2157_s8  }
  0x11   : > { %s1928_s23 = sshll.u32 %s103_s22, 5  ;;  %s1942_s24 = sshll.u32 %s2165_s10, 5 }
  0x12   : > { %s115_s27 = scalar_lea.hbm %s3229_s0, %s1942_s24  ;;  %s107_s28 = scalar_lea.vmem [#allocation2], %s1928_s23 }
  0x13   : > { %s118_s29 = sshll.u32 %s107_s28, 4  ;;  %s116_s30 = sshll.u32 %s115_s27, 4  ;;  %s119_s29 = int_to_ptr.vmem [resolvable:$true] %s118_s29  ;;  %s117_s30 = int_to_ptr.hbm [resolvable:$true] %s116_s30 }
  0x14   : > { %p1950_p13 = pnand %p1957_p12, %p2243_p4  ;;  %p1932_p0 = scmp.ge.s32.totalorder %s2169_s11, 1 }
  0x15   : > { %s104_s2 = scalar_lea.sflag [#allocation3], %s103_s22  ;;  %s2171_s3 = smov 128  }
  0x16   : > { %s2172_s4 = smov 8   ;;  %p126_p1 = scmp.lt.s32.totalorder %s2169_s11, 5 }
  0x17   : > { %1952 = dma.hbm_to_vmem [thread:$0]  (!%p1950_p13), %s117_s30, 512, %s119_s29, %s104_s2, %s2171_s3, %s2171_s3, %s2172_s4  }
  0x18   : > { %p127_p2 = pnand %p1932_p0, %p126_p1 }
  0x1a   : > { %130 = sbr.rel (%p127_p2) target bundleno = 816 (0x330), region = 24 }
  0x1f   : > { %s2275_s5 = sand.u32 1, %s2153_s7  }
  0x20   : > { %s1933_s12 = sshll.u32 %s2275_s5, 5  ;;  %s133_s13 = scalar_lea.sflag [#allocation3], %s2275_s5 }
  0x21   : > { %s2281_s15 = scalar_lea.vmem [#allocation2], %s1933_s12 }
  0x22   : > { %2140 = dma.done.wait (%p2249_p8), %s133_s13, 512  }
  0x23   : > { %2142 = vsyncadd (%p2249_p8), %s133_s13, 4294966784  ;;  %v165_v0 = vlaneseq  ;;  %v160_v2 = vld [vmem:[%s2281_s15] sm:$0xff]  ;;  %v2299_v8 = vld [vmem:[%s2281_s15 + $0x8] sm:$0xff]  ;;  %vm581_vm0 = vcmask 1047556   ;;  %v2173_v43 = vmov 1983009808  }
  0x24   : > { %v190_v3 = vperm.slane %v160_v2, 2  ;;  %v177_v4 = vperm.slane %v160_v2, 1  ;;  %v164_v5 = vperm.slane %v160_v2, 0  ;;  %v216_v7 = vperm.slane %v160_v2, 4  ;;  %v2307_v12 = vld [vmem:[%s2281_s15 + $0x10] sm:$0xff]  ;;  %v2314_v14 = vld [vmem:[%s2281_s15 + $0x18] sm:$0xff] }
  0x25   : > { %v2287_v1 = vshrl.u32 %v165_v0, 7  ;;  %v281_v9 = vperm.slane %v2299_v8, 1  ;;  %v203_v10 = vperm.slane %v160_v2, 3  ;;  %v346_v11 = vperm.slane %v2299_v8, 6  ;;  %s2175_s16 = smov 4   ;;  %s2176_s17 = smov 2  }
  0x26   : > { %v411_v13 = vperm.slane %v2307_v12, 3  ;;  %v229_v15 = vperm.slane %v160_v2, 5  ;;  %v476_v16 = vperm.slane %v2314_v14, 0  ;;  %v242_v17 = vperm.slane %v160_v2, 6  ;;  %s2177_s18 = smov 6   ;;  %s2178_s22 = smov 8  }
  0x27   : > { %2030 = vset.pattern.permute.xlu2 %v2287_v1  ;;  %2029 = vset.pattern.permute.xlu1 %v2287_v1  ;;  %v2294_v6 = vadd.s32 8, %v2287_v1  ;;  %v541_v18 = vperm.slane %v2314_v14, 5  ;;  %v255_v19 = vperm.slane %v160_v2, 7  ;;  %v268_v20 = vperm.slane %v2299_v8, 0  ;;  %s2179_s23 = smov 10   ;;  %s2180_s24 = smov 12  }
  0x28   : > { %2028 = vset.pattern.permute.xlu0 %v2287_v1  ;;  %v307_v21 = vperm.slane %v2299_v8, 3  ;;  %v294_v22 = vperm.slane %v2299_v8, 2  ;;  %v320_v24 = vperm.slane %v2299_v8, 4  ;;  %v372_v25 = vperm.slane %v2307_v12, 0  ;;  %s2181_s25 = smov 14   ;;  %s2182_s26 = smov 16  }
  0x29   : > { %v333_v29 = vperm.slane %v2299_v8, 5  ;;  %v359_v40 = vperm.slane %v2299_v8, 7  ;;  %v586_v44 = vunpack.c.l.s4 %v2173_v43  ;;  %v437_v48 = vperm.slane %v2307_v12, 5  ;;  %s2183_s27 = smov 18   ;;  %s2184_s28 = smov 20  }
  0x2a   : > { %v502_v61 = vperm.slane %v2314_v14, 2  ;;  %v567_v8 = vperm.slane %v2314_v14, 7  ;;  %vm1717_vm1 = vcmask 15360   ;;  %vm1722_vm2 = vcmask 31744   ;;  %s2185_s29 = smov 22   ;;  %s2186_s30 = smov 24  }
  0x2b   : > { %v2357_v49 = vunpack.c.0.s8 %v586_v44  ;;  %vm1727_vm3 = vcmask 48128   ;;  %s2187_s2 = smov 26   ;;  %vm1732_vm4 = vcmask 64512   ;;  %s2188_s3 = smov 28   ;;  %vm1737_vm5 = vcmask 80896  }
  0x2c   : > { %s2189_s4 = smov 30   ;;  %vm1742_vm6 = vcmask 97280   ;;  %vm1747_vm7 = vcmask 113664   ;;  %vm1752_vm8 = vcmask 130048   ;;  %vm1757_vm9 = vcmask 146432   ;;  %s2190_s13 = smov 32  }
  0x2d   : > { %vm1762_vm10 = vcmask 162816   ;;  %vm1772_vm11 = vcmask 195584   ;;  %vm1767_vm12 = vcmask 179200   ;;  %vm1777_vm13 = vcmask 211968   ;;  %s3153_s15 = scalar_lea.vmem [#allocation5], %s1933_s12  ;;  %s1944_s12 = sshll.u32 %s2161_s9, 5 }
  0x2e   : > { %vm1787_vm14 = vcmask 244736   ;;  %vm1782_vm15 = vcmask 228352  }
  0x2f   : > { %195 = vperm.xlu2 %2030, %v190_v3   ;;  %182 = vperm.xlu1 %2029, %v177_v4  }
  0x30   : > { %169 = vperm.xlu0 %2028, %v164_v5  }
  0x37   : > { %2033 = vset.pattern.permute.xlu2 %v2294_v6  ;;  %2031 = vset.pattern.permute.xlu1 %v2294_v6 }
  0x38   : > { %221 = vperm.xlu0 %2028, %v216_v7  }
  0x3f   : > { %201 = vperm.xlu2 %2033, %v190_v3   ;;  %188 = vperm.xlu1 %2031, %v177_v4  }
  0x40   : > { %286 = vperm.xlu0 %2028, %v281_v9  }
  0x47   : > { %214 = vperm.xlu2 %2033, %v203_v10   ;;  %2032 = vset.pattern.permute.xlu1 %v2287_v1 }
  0x48   : > { %351 = vperm.xlu0 %2028, %v346_v11  }
  0x4f   : > { %2035 = vset.pattern.permute.xlu2 %v2287_v1  ;;  %208 = vperm.xlu1 %2032, %v203_v10  }
  0x50   : > { %416 = vperm.xlu0 %2028, %v411_v13  }
  0x57   : > { %234 = vperm.xlu2 %2035, %v229_v15   ;;  %2034 = vset.pattern.permute.xlu1 %v2294_v6 }
  0x58   : > { %481 = vperm.xlu0 %2028, %v476_v16  }
  0x5f   : > { %247 = vperm.xlu2 %2035, %v242_v17   ;;  %227 = vperm.xlu1 %2034, %v216_v7   ;;  %v385_v7 = vperm.slane %v2307_v12, 1 }
  0x60   : > { %546 = vperm.xlu0 %2028, %v541_v18  }
  0x67   : > { %2037 = vset.pattern.permute.xlu2 %v2294_v6  ;;  %240 = vperm.xlu1 %2034, %v229_v15   ;;  %v398_v15 = vperm.slane %v2307_v12, 2 }
  0x68   : > { %2054 = vset.pattern.permute.xlu0 %v2294_v6 }
  0x6f   : > { %266 = vperm.xlu2 %2037, %v255_v19   ;;  %2036 = vset.pattern.permute.xlu1 %v2287_v1 }
  0x70   : > { %175 = vperm.xlu0 %2054, %v164_v5  }
  0x77   : > { %279 = vperm.xlu2 %2037, %v268_v20   ;;  %260 = vperm.xlu1 %2036, %v255_v19  }
  0x78   : > { %253 = vperm.xlu0 %2054, %v242_v17  }
  0x7f   : > { %2039 = vset.pattern.permute.xlu2 %v2287_v1  ;;  %273 = vperm.xlu1 %2036, %v268_v20  }
  0x80   : > { %318 = vperm.xlu0 %2054, %v307_v21  }
  0x87   : > { %299 = vperm.xlu2 %2039, %v294_v22   ;;  %2038 = vset.pattern.permute.xlu1 %v2294_v6 }
  0x88   : > { %383 = vperm.xlu0 %2054, %v372_v25  }
  0x89   : > { %v196_v23 = vpop.permute.xlu2 %195 }
  0x8a   : > { %v580_v53 = vrot.slane %v196_v23, 4 }
  0x8f   : > { %312 = vperm.xlu2 %2039, %v307_v21   ;;  %292 = vperm.xlu1 %2038, %v281_v9  }
  0x90   : > { %448 = vperm.xlu0 %2054, %v437_v48  }
  0x97   : > { %2041 = vset.pattern.permute.xlu2 %v2294_v6  ;;  %305 = vperm.xlu1 %2038, %v294_v22  }
  0x98   : > { %513 = vperm.xlu0 %2054, %v502_v61  }
  0x99   : > { %v2334_v26 = vpop.permute.xlu2 %201 }
  0x9a   : > { %v805_v44 = vrot.slane %v2334_v26, 4 }
  0x9f   : > { %331 = vperm.xlu2 %2041, %v320_v24   ;;  %2040 = vset.pattern.permute.xlu1 %v2287_v1 }
  0xa0   : > { %578 = vperm.xlu0 %2054, %v567_v8  }
  0xa1   : > { %v215_v31 = vpop.permute.xlu2 %214  ;;  %v183_v32 = vpop.permute.xlu1 %182 }
  0xa2   : > { %v170_v27 = vpop.permute.xlu0 %169  ;;  %v817_v34 = vrot.slane %v215_v31, 4  ;;  %v595_v51 = vrot.slane %v183_v32, 4 }
  0xa3   : > { %v583_v28 = vrot.slane %v170_v27, 4  ;;  %v582_v58 = vsel %vm581_vm0, %v580_v53, %v170_v27  ;;  %v2174_v27 = vmov 1934713408  }
  0xa4   : > { %v588_v2 = vperm.slane %v582_v58, %v2357_v49 }
  0xa5   : > { %v584_v30 = vsel %vm581_vm0, %v196_v23, %v583_v28  ;;  %v634_v28 = vunpack.c.l.s4 %v2174_v27 }
  0xa6   : > { %v592_v50 = vperm.slane %v584_v30, %v2357_v49 }
  0xa7   : > { %344 = vperm.xlu2 %2041, %v333_v29   ;;  %325 = vperm.xlu1 %2040, %v320_v24  }
  0xa8   : > { %v643_v56 = vrot.slane %v592_v50, 4 }
  0xaa   : > { %v2339_v33 = vpop.permute.xlu0 %221 }
  0xab   : > { %v607_v42 = vrot.slane %v2339_v33, 4 }
  0xaf   : > { %2043 = vset.pattern.permute.xlu2 %v2287_v1  ;;  %338 = vperm.xlu1 %2040, %v333_v29  }
  0xb1   : > { %v2342_v35 = vpop.permute.xlu2 %234  ;;  %v189_v36 = vpop.permute.xlu1 %188 }
  0xb2   : > { %v2345_v37 = vsel %vm581_vm0, %v817_v34, %v189_v36  ;;  %v819_v38 = vrot.slane %v189_v36, 4  ;;  %v2347_v39 = vpop.permute.xlu0 %286 }
  0xb3   : > { %v2407_v34 = vperm.slane %v2345_v37, %v2357_v49  ;;  %v707_v37 = vrot.slane %v2347_v39, 4 }
  0xb4   : > { %v820_v41 = vsel %vm581_vm0, %v215_v31, %v819_v38  ;;  %v424_v38 = vperm.slane %v2307_v12, 4 }
  0xb5   : > { %v2403_v31 = vperm.slane %v820_v41, %v2357_v49  ;;  %v853_v53 = vrot.slane %v2407_v34, 4 }
  0xb7   : > { %364 = vperm.xlu2 %2043, %v359_v40   ;;  %2042 = vset.pattern.permute.xlu1 %v2294_v6 }
  0xb9   : > { %v248_v45 = vpop.permute.xlu2 %247 }
  0xba   : > { %v608_v46 = vsel %vm581_vm0, %v248_v45, %v607_v42  ;;  %v2354_v47 = vpop.permute.xlu0 %351  ;;  %v631_v42 = vrot.slane %v588_v2, 4 }
  0xbf   : > { %377 = vperm.xlu2 %2043, %v372_v25   ;;  %357 = vperm.xlu1 %2042, %v346_v11   ;;  %v605_v25 = vrot.slane %v248_v45, 4  ;;  %v865_v45 = vrot.slane %v2403_v31, 4 }
  0xc1   : > { %v209_v52 = vpop.permute.xlu1 %208  ;;  %v606_v29 = vsel %vm581_vm0, %v605_v25, %v2339_v33  ;;  %v616_v33 = vperm.slane %v608_v46, %v2357_v49 }
  0xc2   : > { %v593_v54 = vrot.slane %v209_v52, 4  ;;  %v596_v55 = vsel %vm581_vm0, %v209_v52, %v595_v51  ;;  %v2368_v60 = vpop.permute.xlu0 %416  ;;  %v612_v43 = vperm.slane %v606_v29, %v2357_v49  ;;  %v619_v52 = vrot.slane %v2342_v35, 4 }
  0xc3   : > { %v604_v57 = vperm.slane %v596_v55, %v2357_v49  ;;  %v667_v55 = vrot.slane %v616_v33, 4 }
  0xc4   : > { %v594_v59 = vsel %vm581_vm0, %v593_v54, %v183_v32  ;;  %v655_v54 = vrot.slane %v612_v43, 4 }
  0xc5   : > { %v600_v62 = vperm.slane %v594_v59, %v2357_v49  ;;  %v641_v63 = vrot.slane %v604_v57, 4  ;;  %v644_v0 = vsel %vm581_vm0, %v604_v57, %v643_v56 }
  0xc7   : > { %v629_v3 = vrot.slane %v600_v62, 4  ;;  %2045 = vset.pattern.permute.xlu2 %v2294_v6  ;;  %370 = vperm.xlu1 %2042, %v359_v40   ;;  %v642_v4 = vsel %vm581_vm0, %v641_v63, %v592_v50  ;;  %v2410_v40 = vunpack.c.0.s8 %v634_v28  ;;  %v632_v51 = vsel %vm581_vm0, %v600_v62, %v631_v42 }
  0xc9   : > { %v2379_v5 = vsel %vm581_vm0, %v629_v3, %v588_v2  ;;  %v267_v10 = vpop.permute.xlu2 %266  ;;  %v2447_v2 = vperm.slane %v642_v4, %v2410_v40 }
  0xca   : > { %v2383_v9 = vpop.permute.xlu0 %481  ;;  %v841_v17 = vrot.slane %v267_v10, 4  ;;  %v636_v28 = vperm.slane %v2379_v5, %v2410_v40 }
  0xcf   : > { %396 = vperm.xlu2 %2045, %v385_v7   ;;  %2044 = vset.pattern.permute.xlu1 %v2287_v1 }
  0xd1   : > { %v2388_v11 = vpop.permute.xlu1 %227  ;;  %v2393_v20 = vpop.permute.xlu2 %279 }
  0xd2   : > { %v2391_v19 = vpop.permute.xlu0 %546  ;;  %v831_v58 = vrot.slane %v2388_v11, 4 }
  0xd7   : > { %409 = vperm.xlu2 %2045, %v398_v15   ;;  %390 = vperm.xlu1 %2044, %v385_v7  }
  0xd9   : > { %v241_v21 = vpop.permute.xlu1 %240 }
  0xda   : > { %v842_v22 = vsel %vm581_vm0, %v841_v17, %v241_v21  ;;  %v843_v23 = vrot.slane %v241_v21, 4 }
  0xdb   : > { %v2441_v59 = vperm.slane %v842_v22, %v2357_v49 }
  0xdc   : > { %v844_v24 = vsel %vm581_vm0, %v267_v10, %v843_v23 }
  0xdd   : > { %v2433_v56 = vperm.slane %v844_v24, %v2357_v49  ;;  %v877_v29 = vrot.slane %v2441_v59, 4 }
  0xdf   : > { %2047 = vset.pattern.permute.xlu2 %v2287_v1  ;;  %403 = vperm.xlu1 %2044, %v398_v15   ;;  %v889_v25 = vrot.slane %v2433_v56, 4 }
  0xe1   : > { %v2400_v30 = vpop.permute.xlu2 %299 }
  0xe2   : > { %v176_v32 = vpop.permute.xlu0 %175 }
  0xe3   : > { %v807_v36 = vrot.slane %v176_v32, 4  ;;  %v806_v46 = vsel %vm581_vm0, %v805_v44, %v176_v32 }
  0xe4   : > { %v812_v3 = vperm.slane %v806_v46, %v2357_v49 }
  0xe5   : > { %v808_v41 = vsel %vm581_vm0, %v2334_v26, %v807_v36  ;;  %v2430_v26 = vperm.slane %v644_v0, %v2410_v40  ;;  %v640_v0 = vperm.slane %v632_v51, %v2410_v40 }
  0xe6   : > { %v2420_v50 = vperm.slane %v808_v41, %v2357_v49  ;;  %v854_v44 = vsel %vm581_vm0, %v853_v53, %v812_v3 }
  0xe7   : > { %429 = vperm.xlu2 %2047, %v424_v38   ;;  %2046 = vset.pattern.permute.xlu1 %v2294_v6  ;;  %v691_v24 = vrot.slane %v2430_v26, 4  ;;  %v683_v42 = vrot.slane %v640_v0, 4 }
  0xe8   : > { %v2437_v57 = vsel %vm581_vm0, %v865_v45, %v2420_v50 }
  0xe9   : > { %v2443_v62 = vpop.permute.xlu2 %312  ;;  %v261_v63 = vpop.permute.xlu1 %260 }
  0xea   : > { %v708_v7 = vsel %vm581_vm0, %v2443_v62, %v707_v37  ;;  %v617_v10 = vrot.slane %v261_v63, 4  ;;  %v620_v15 = vsel %vm581_vm0, %v261_v63, %v619_v52  ;;  %v254_v17 = vpop.permute.xlu0 %253  ;;  %v855_v37 = vrot.slane %v812_v3, 4 }
  0xeb   : > { %v628_v21 = vperm.slane %v620_v15, %v2357_v49  ;;  %v829_v22 = vrot.slane %v254_v17, 4  ;;  %v832_v23 = vsel %vm581_vm0, %v254_v17, %v831_v58  ;;  %v716_v58 = vperm.slane %v708_v7, %v2357_v49 }
  0xec   : > { %v618_v4 = vsel %vm581_vm0, %v617_v10, %v2342_v35  ;;  %v2460_v27 = vperm.slane %v832_v23, %v2357_v49  ;;  %v679_v15 = vrot.slane %v636_v28, 4  ;;  %v867_v17 = vrot.slane %v2420_v50, 4 }
  0xed   : > { %v624_v32 = vperm.slane %v618_v4, %v2357_v49  ;;  %v665_v36 = vrot.slane %v628_v21, 4  ;;  %v668_v41 = vsel %vm581_vm0, %v628_v21, %v667_v55  ;;  %v830_v45 = vsel %vm581_vm0, %v829_v22, %v2388_v11 }
  0xee   : > { %v890_v35 = vsel %vm581_vm0, %v889_v25, %v2460_v27  ;;  %v836_v5 = vperm.slane %v830_v45, %v2357_v49  ;;  %v676_v11 = vperm.slane %v668_v41, %v2410_v40  ;;  %v687_v55 = vrot.slane %v2447_v2, 4 }
  0xef   : > { %v653_v51 = vrot.slane %v624_v32, 4  ;;  %442 = vperm.xlu2 %2047, %v437_v48   ;;  %422 = vperm.xlu1 %2046, %v411_v13   ;;  %v656_v52 = vsel %vm581_vm0, %v624_v32, %v655_v54  ;;  %v666_v46 = vsel %vm581_vm0, %v665_v36, %v616_v33  ;;  %v860_v33 = vperm.slane %v854_v44, %v2410_v40 }
  0xf0   : > { %v664_v53 = vperm.slane %v656_v52, %v2410_v40  ;;  %v672_v48 = vperm.slane %v666_v46, %v2410_v40  ;;  %v878_v13 = vsel %vm581_vm0, %v877_v29, %v836_v5  ;;  %v689_v4 = vrot.slane %v676_v11, 4 }
  0xf1   : > { %v2483_v63 = vpop.permute.xlu1 %273  ;;  %v654_v3 = vsel %vm581_vm0, %v653_v51, %v612_v43  ;;  %v856_v43 = vsel %vm581_vm0, %v2407_v34, %v855_v37  ;;  %v753_v29 = vrot.slane %v716_v58, 4  ;;  %v879_v32 = vrot.slane %v836_v5, 4 }
  0xf2   : > { %v695_v54 = vrot.slane %v2483_v63, 4  ;;  %v681_v10 = vrot.slane %v664_v53, 4  ;;  %v660_v21 = vperm.slane %v654_v3, %v2410_v40  ;;  %v2493_v7 = vsel %vm581_vm0, %v664_v53, %v683_v42 }
  0xf3   : > { %v685_v25 = vrot.slane %v672_v48, 4  ;;  %v864_v44 = vperm.slane %v856_v43, %v2410_v40  ;;  %v2521_v37 = vsel %vm581_vm0, %v672_v48, %v687_v55  ;;  %v891_v51 = vrot.slane %v2460_v27, 4 }
  0xf4   : > { %v696_v22 = vsel %vm581_vm0, %v2400_v30, %v695_v54  ;;  %v682_v23 = vsel %vm581_vm0, %v681_v10, %v640_v0  ;;  %v2503_v50 = vsel %vm581_vm0, %v660_v21, %v679_v15  ;;  %v677_v42 = vrot.slane %v660_v21, 4 }
  0xf5   : > { %v704_v36 = vperm.slane %v696_v22, %v2357_v49  ;;  %1497 = vrot.lane.b32.xlu0 %v682_v23, %s2175_s16  ;;  %v2507_v34 = vsel %vm581_vm0, %v685_v25, %v2447_v2  ;;  %v2511_v0 = vsel %vm581_vm0, %v689_v4, %v2430_v26  ;;  %v896_v2 = vperm.slane %v890_v35, %v2410_v40 }
  0xf6   : > { %v2526_v26 = vsel %vm581_vm0, %v677_v42, %v636_v28  ;;  %v903_v5 = vrot.slane %v860_v33, 4  ;;  %v872_v52 = vperm.slane %v2437_v57, %v2410_v40  ;;  %v884_v46 = vperm.slane %v878_v13, %v2410_v40 }
  0xf7   : > { %v755_v41 = vrot.slane %v704_v36, 4  ;;  %2049 = vset.pattern.permute.xlu2 %v2294_v6  ;;  %435 = vperm.xlu1 %2046, %v424_v38   ;;  %v2518_v45 = vsel %vm581_vm0, %v753_v29, %v704_v36  ;;  %v2534_v38 = vsel %vm581_vm0, %v676_v11, %v691_v24  ;;  %v880_v35 = vsel %vm581_vm0, %v2441_v59, %v879_v32 }
  0xf8   : > { %v450_v27 = vperm.slane %v2307_v12, 6  ;;  %v907_v55 = vrot.slane %v864_v44, 4  ;;  %v2541_v28 = vsel %vm581_vm0, %v884_v46, %v903_v5  ;;  %v901_v3 = vrot.slane %v884_v46, 4 }
  0xf9   : > { %v2531_v53 = vsel %vm581_vm0, %v716_v58, %v755_v41  ;;  %v888_v57 = vperm.slane %v880_v35, %v2410_v40  ;;  %v909_v48 = vrot.slane %v896_v2, 4  ;;  %v911_v58 = vrot.slane %v872_v52, 4  ;;  %v2574_v42 = vpop.permute.xlu2 %331 }
  0xfa   : > { %v868_v24 = vsel %vm581_vm0, %v2403_v31, %v867_v17  ;;  %v892_v11 = vsel %vm581_vm0, %v2433_v56, %v891_v51  ;;  %v2549_v13 = vsel %vm581_vm0, %v901_v3, %v860_v33  ;;  %v319_v56 = vpop.permute.xlu0 %318  ;;  %v463_v29 = vperm.slane %v2307_v12, 7 }
  0xfb   : > { %v905_v59 = vrot.slane %v888_v57, 4  ;;  %v2552_v54 = vsel %vm581_vm0, %v909_v48, %v872_v52  ;;  %v2555_v10 = vsel %vm581_vm0, %v888_v57, %v907_v55  ;;  %v2558_v15 = vsel %vm581_vm0, %v896_v2, %v911_v58 }
  0xfc   : > { %3235 = vst [vmem:[#allocation8_spill] sm:$0xff] %v2558_v15  ;;  %v876_v21 = vperm.slane %v868_v24, %v2410_v40  ;;  %v900_v31 = vperm.slane %v892_v11, %v2410_v40  ;;  %v929_v23 = vrot.slane %v319_v56, 4  ;;  %v919_v2 = vrot.slane %v2393_v20, 4 }
  0xfd   : > { %v2564_v33 = vsel %vm581_vm0, %v905_v59, %v864_v44 }
  0xfe   : > { %v915_v17 = vrot.slane %v876_v21, 4  ;;  %v913_v43 = vrot.slane %v900_v31, 4 }
  0xff   : > { %461 = vperm.xlu2 %2049, %v450_v27   ;;  %2048 = vset.pattern.permute.xlu1 %v2287_v1 }
 0x100   : > { %v2567_v4 = vsel %vm581_vm0, %v900_v31, %v915_v17  ;;  %v2571_v32 = vsel %vm581_vm0, %v913_v43, %v876_v21  ;;  %v489_v21 = vperm.slane %v2314_v14, 1 }
 0x101   : > { %v293_v22 = vpop.permute.xlu1 %292  ;;  %3236 = vst [vmem:[#allocation9_spill] sm:$0xff] %v2567_v4  ;;  %v2588_v58 = vpop.permute.xlu2 %344 }
 0x102   : > { %v931_v25 = vrot.slane %v293_v22, 4  ;;  %3237 = vst [vmem:[#allocation10_spill] sm:$0xff] %v2571_v32  ;;  %v930_v44 = vsel %vm581_vm0, %v929_v23, %v293_v22  ;;  %v717_v23 = vrot.slane %v2354_v47, 4 }
 0x103   : > { %v936_v51 = vperm.slane %v930_v44, %v2357_v49 }
 0x104   : > { %v932_v36 = vsel %vm581_vm0, %v319_v56, %v931_v25  ;;  %v705_v56 = vrot.slane %v2443_v62, 4  ;;  %v693_v25 = vrot.slane %v2400_v30, 4 }
 0x105   : > { %v940_v41 = vperm.slane %v932_v36, %v2357_v49  ;;  %v965_v3 = vrot.slane %v936_v51, 4 }
 0x106   : > { %v706_v22 = vsel %vm581_vm0, %v705_v56, %v2347_v39  ;;  %v694_v36 = vsel %vm581_vm0, %v693_v25, %v2483_v63  ;;  %v515_v25 = vperm.slane %v2314_v14, 3 }
 0x107   : > { %474 = vperm.xlu2 %2049, %v463_v29   ;;  %455 = vperm.xlu1 %2048, %v450_v27   ;;  %v977_v46 = vrot.slane %v940_v41, 4  ;;  %v2614_v62 = vperm.slane %v706_v22, %v2357_v49 }
 0x109   : > { %v306_v5 = vpop.permute.xlu1 %305 }
 0x10a   : > { %v917_v52 = vrot.slane %v306_v5, 4  ;;  %v920_v12 = vsel %vm581_vm0, %v306_v5, %v919_v2  ;;  %v741_v5 = vrot.slane %v2614_v62, 4 }
 0x10b   : > { %v928_v35 = vperm.slane %v920_v12, %v2357_v49 }
 0x10c   : > { %v918_v55 = vsel %vm581_vm0, %v917_v52, %v2393_v20  ;;  %v764_v52 = vperm.slane %v2531_v53, %v2410_v40 }
 0x10d   : > { %v924_v57 = vperm.slane %v918_v55, %v2357_v49  ;;  %v979_v48 = vrot.slane %v928_v35, 4  ;;  %v2586_v27 = vsel %vm581_vm0, %v977_v46, %v928_v35 }
 0x10f   : > { %v967_v24 = vrot.slane %v924_v57, 4  ;;  %2051 = vset.pattern.permute.xlu2 %v2287_v1  ;;  %468 = vperm.xlu1 %2048, %v463_v29   ;;  %v2592_v11 = vsel %vm581_vm0, %v965_v3, %v924_v57  ;;  %v2595_v59 = vsel %vm581_vm0, %v940_v41, %v979_v48  ;;  %v760_v3 = vperm.slane %v2518_v45, %v2410_v40 }
 0x111   : > { %v2598_v20 = vsel %vm581_vm0, %v936_v51, %v967_v24  ;;  %v365_v31 = vpop.permute.xlu2 %364  ;;  %v2624_v51 = vperm.slane %v694_v36, %v2357_v49 }
 0x112   : > { %v729_v39 = vrot.slane %v365_v31, 4 }
 0x113   : > { %v742_v57 = vsel %vm581_vm0, %v741_v5, %v2624_v51 }
 0x114   : > { %v2654_v22 = vperm.slane %v742_v57, %v2410_v40 }
 0x117   : > { %494 = vperm.xlu2 %2051, %v489_v21   ;;  %2050 = vset.pattern.permute.xlu1 %v2294_v6 }
 0x119   : > { %v326_v17 = vpop.permute.xlu1 %325  ;;  %v2618_v44 = vpop.permute.xlu2 %377 }
 0x11a   : > { %v719_v43 = vrot.slane %v326_v17, 4 }
 0x11c   : > { %v720_v29 = vsel %vm581_vm0, %v2354_v47, %v719_v43  ;;  %v718_v47 = vsel %vm581_vm0, %v717_v23, %v326_v17  ;;  %v803_v43 = vrot.slane %v764_v52, 4  ;;  %v799_v23 = vrot.slane %v760_v3, 4 }
 0x11d   : > { %v728_v30 = vperm.slane %v720_v29, %v2357_v49  ;;  %v2634_v12 = vperm.slane %v718_v47, %v2357_v49  ;;  %v2658_v29 = vpop.permute.xlu0 %383 }
 0x11e   : > { %v1255_v5 = vrot.slane %v2658_v29, 4 }
 0x11f   : > { %507 = vperm.xlu2 %2051, %v502_v61   ;;  %487 = vperm.xlu1 %2050, %v476_v16   ;;  %v779_v46 = vrot.slane %v728_v30, 4 }
 0x121   : > { %v339_v41 = vpop.permute.xlu1 %338 }
 0x122   : > { %v730_v2 = vsel %vm581_vm0, %v729_v39, %v339_v41  ;;  %v731_v61 = vrot.slane %v339_v41, 4 }
 0x123   : > { %v2627_v16 = vperm.slane %v730_v2, %v2357_v49 }
 0x124   : > { %v732_v63 = vsel %vm581_vm0, %v365_v31, %v731_v61 }
 0x125   : > { %v740_v35 = vperm.slane %v732_v63, %v2357_v49  ;;  %v765_v55 = vrot.slane %v2627_v16, 4 }
 0x127   : > { %v777_v48 = vrot.slane %v740_v35, 4  ;;  %2053 = vset.pattern.permute.xlu2 %v2294_v6  ;;  %500 = vperm.xlu1 %2050, %v489_v21   ;;  %v766_v53 = vsel %vm581_vm0, %v765_v55, %v2634_v12  ;;  %v780_v24 = vsel %vm581_vm0, %v740_v35, %v779_v46  ;;  %v943_v46 = vrot.slane %v2574_v42, 4 }
 0x128   : > { %v2647_v31 = vperm.slane %v766_v53, %v2410_v40  ;;  %v788_v56 = vperm.slane %v780_v24, %v2410_v40  ;;  %v528_v53 = vperm.slane %v2314_v14, 4 }
 0x129   : > { %v2650_v17 = vpop.permute.xlu2 %396  ;;  %v778_v45 = vsel %vm581_vm0, %v777_v48, %v728_v30 }
 0x12a   : > { %v789_v21 = vrot.slane %v2647_v31, 4  ;;  %v784_v36 = vperm.slane %v778_v45, %v2410_v40  ;;  %v801_v39 = vrot.slane %v788_v56, 4  ;;  %v2662_v41 = vsel %vm581_vm0, %v788_v56, %v803_v43 }
 0x12b   : > { %v955_v56 = vrot.slane %v2588_v58, 4 }
 0x12c   : > { %v2666_v30 = vsel %vm581_vm0, %v789_v21, %v2654_v22  ;;  %v2669_v47 = vsel %vm581_vm0, %v784_v36, %v799_v23  ;;  %v797_v2 = vrot.slane %v784_v36, 4  ;;  %v2672_v61 = vsel %vm581_vm0, %v801_v39, %v764_v52 }
 0x12d   : > { %v988_v36 = vperm.slane %v2595_v59, %v2410_v40  ;;  %v972_v59 = vperm.slane %v2592_v11, %v2410_v40 }
 0x12e   : > { %v2677_v63 = vsel %vm581_vm0, %v797_v2, %v760_v3 }
 0x12f   : > { %526 = vperm.xlu2 %2053, %v515_v25   ;;  %2052 = vset.pattern.permute.xlu1 %v2287_v1 }
 0x131   : > { %v2680_v35 = vpop.permute.xlu2 %409  ;;  %v358_v55 = vpop.permute.xlu1 %357 }
 0x132   : > { %v2684_v57 = vsel %vm581_vm0, %v2680_v35, %v1255_v5  ;;  %v941_v48 = vrot.slane %v358_v55, 4  ;;  %v944_v52 = vsel %vm581_vm0, %v358_v55, %v943_v46  ;;  %v984_v5 = vperm.slane %v2586_v27, %v2410_v40 }
 0x133   : > { %v952_v3 = vperm.slane %v944_v52, %v2357_v49 }
 0x134   : > { %v942_v24 = vsel %vm581_vm0, %v941_v48, %v2574_v42  ;;  %v976_v42 = vperm.slane %v2598_v20, %v2410_v40 }
 0x135   : > { %v948_v45 = vperm.slane %v942_v24, %v2357_v49  ;;  %v1003_v39 = vrot.slane %v952_v3, 4 }
 0x136   : > { %v1019_v20 = vrot.slane %v976_v42, 4 }
 0x137   : > { %539 = vperm.xlu2 %2053, %v528_v53   ;;  %520 = vperm.xlu1 %2052, %v515_v25   ;;  %v991_v46 = vrot.slane %v948_v45, 4 }
 0x139   : > { %v371_v43 = vpop.permute.xlu1 %370 }
 0x13a   : > { %v953_v21 = vrot.slane %v371_v43, 4  ;;  %v956_v23 = vsel %vm581_vm0, %v371_v43, %v955_v56  ;;  %v1027_v56 = vrot.slane %v988_v36, 4 }
 0x13b   : > { %v964_v2 = vperm.slane %v956_v23, %v2357_v49 }
 0x13c   : > { %v954_v25 = vsel %vm581_vm0, %v953_v21, %v2588_v58 }
 0x13d   : > { %v960_v55 = vperm.slane %v954_v25, %v2357_v49  ;;  %v1001_v48 = vrot.slane %v964_v2, 4  ;;  %v1004_v52 = vsel %vm581_vm0, %v964_v2, %v1003_v39  ;;  %v1023_v25 = vrot.slane %v984_v5, 4 }
 0x13e   : > { %v1012_v24 = vperm.slane %v1004_v52, %v2410_v40 }
 0x13f   : > { %v989_v43 = vrot.slane %v960_v55, 4  ;;  %2056 = vset.pattern.permute.xlu2 %v2287_v1  ;;  %533 = vperm.xlu1 %2052, %v528_v53   ;;  %v992_v58 = vsel %vm581_vm0, %v960_v55, %v991_v46  ;;  %v1002_v27 = vsel %vm581_vm0, %v1001_v48, %v952_v3  ;;  %v1015_v1 = vrot.slane %v972_v59, 4 }
 0x140   : > { %v1000_v21 = vperm.slane %v992_v58, %v2410_v40  ;;  %v1008_v23 = vperm.slane %v1002_v27, %v2410_v40  ;;  %v1025_v39 = vrot.slane %v1012_v24, 4  ;;  %v2714_v2 = vsel %vm581_vm0, %v1012_v24, %v1027_v56 }
 0x141   : > { %3238 = vst [vmem:[#allocation11_spill] sm:$0xff] %v2714_v2  ;;  %v990_v11 = vsel %vm581_vm0, %v989_v43, %v948_v45  ;;  %v554_v3 = vperm.slane %v2314_v14, 6  ;;  %v2740_v27 = vpop.permute.xlu2 %429 }
 0x142   : > { %v996_v52 = vperm.slane %v990_v11, %v2410_v40  ;;  %v2719_v53 = vsel %vm581_vm0, %v1000_v21, %v1019_v20  ;;  %v1017_v46 = vrot.slane %v1000_v21, 4  ;;  %v1021_v55 = vrot.slane %v1008_v23, 4 }
 0x143   : > { %v2723_v48 = vsel %vm581_vm0, %v1025_v39, %v988_v36  ;;  %v2726_v58 = vsel %vm581_vm0, %v1008_v23, %v1023_v25 }
 0x144   : > { %3239 = vst [vmem:[#allocation12_spill] sm:$0xff] %v2723_v48  ;;  %v1013_v24 = vrot.slane %v996_v52, 4  ;;  %v2729_v45 = vsel %vm581_vm0, %v996_v52, %v1015_v1  ;;  %v2732_v56 = vsel %vm581_vm0, %v1017_v46, %v976_v42  ;;  %v2735_v43 = vsel %vm581_vm0, %v1021_v55, %v984_v5 }
 0x145   : > { %3240 = vst [vmem:[#allocation13_spill] sm:$0xff] %v2726_v58  ;;  %v1031_v5 = vrot.slane %v2618_v44, 4  ;;  %v791_v52 = vrot.slane %v2654_v22, 4  ;;  %v1253_v55 = vrot.slane %v2680_v35, 4 }
 0x146   : > { %3241 = vst [vmem:[#allocation14_spill] sm:$0xff] %v2735_v43  ;;  %v2738_v20 = vsel %vm581_vm0, %v1013_v24, %v972_v59  ;;  %v1267_v24 = vrot.slane %v2650_v17, 4 }
 0x147   : > { %559 = vperm.xlu2 %2056, %v554_v3   ;;  %2055 = vset.pattern.permute.xlu1 %v2294_v6  ;;  %v792_v14 = vsel %vm581_vm0, %v2647_v31, %v791_v52  ;;  %v1254_v22 = vsel %vm581_vm0, %v1253_v55, %v2658_v29  ;;  %v1264_v31 = vperm.slane %v2684_v57, %v2357_v49 }
 0x149   : > { %v2743_v36 = vpop.permute.xlu1 %390  ;;  %v2754_v59 = vpop.permute.xlu2 %442 }
 0x14a   : > { %v1043_v21 = vrot.slane %v2743_v36, 4 }
 0x14c   : > { %v1044_v23 = vsel %vm581_vm0, %v2368_v60, %v1043_v21  ;;  %v1260_v21 = vperm.slane %v1254_v22, %v2357_v49 }
 0x14d   : > { %v1052_v42 = vperm.slane %v1044_v23, %v2357_v49 }
 0x14f   : > { %572 = vperm.xlu2 %2056, %v567_v8   ;;  %552 = vperm.xlu1 %2055, %v541_v18   ;;  %v1089_v11 = vrot.slane %v1052_v42, 4 }
 0x151   : > { %v2756_v6 = vpop.permute.xlu1 %403 }
 0x152   : > { %v1032_v39 = vsel %vm581_vm0, %v2756_v6, %v1031_v5 }
 0x153   : > { %v1040_v25 = vperm.slane %v1032_v39, %v2357_v49 }
 0x155   : > { %v1091_v1 = vrot.slane %v1040_v25, 4  ;;  %v2763_v8 = vsel %vm581_vm0, %v1089_v11, %v1040_v25  ;;  %v1315_v25 = vrot.slane %v1264_v31, 4 }
 0x157   : > { %565 = vperm.xlu1 %2055, %v554_v3   ;;  %1483 = vrot.lane.b32.xlu2 %v792_v14, %s2176_s17  ;;  %v2769_v18 = vsel %vm581_vm0, %v1052_v42, %v1091_v1  ;;  %v449_v3 = vpop.permute.xlu0 %448  ;;  %v1303_v1 = vrot.slane %v1260_v21, 4 }
 0x158   : > { %v1291_v23 = vrot.slane %v449_v3, 4 }
 0x159   : > { %v462_v46 = vpop.permute.xlu2 %461 }
 0x15f   : > { %1481 = vrot.lane.b32.xlu1 %v2503_v50, %s2176_s17 }
 0x161   : > { %v475_v42 = vpop.permute.xlu2 %474  ;;  %v423_v5 = vpop.permute.xlu1 %422 }
 0x162   : > { %v1289_v39 = vrot.slane %v475_v42, 4  ;;  %v1265_v11 = vrot.slane %v423_v5, 4  ;;  %v1268_v35 = vsel %vm581_vm0, %v423_v5, %v1267_v24  ;;  %v1292_v57 = vsel %vm581_vm0, %v475_v42, %v1291_v23 }
 0x163   : > { %v1276_v29 = vperm.slane %v1268_v35, %v2357_v49  ;;  %v1277_v35 = vrot.slane %v462_v46, 4 }
 0x164   : > { %v1290_v50 = vsel %vm581_vm0, %v1289_v39, %v449_v3  ;;  %v1266_v52 = vsel %vm581_vm0, %v1265_v11, %v2650_v17  ;;  %v1300_v3 = vperm.slane %v1292_v57, %v2357_v49 }
 0x165   : > { %v1272_v14 = vperm.slane %v1266_v52, %v2357_v49  ;;  %v1313_v55 = vrot.slane %v1276_v29, 4  ;;  %v1316_v22 = vsel %vm581_vm0, %v1276_v29, %v1315_v25  ;;  %v1296_v2 = vperm.slane %v1290_v50, %v2357_v49 }
 0x166   : > { %v1337_v50 = vrot.slane %v1300_v3, 4 }
 0x167   : > { %v1301_v32 = vrot.slane %v1272_v14, 4  ;;  %v1304_v24 = vsel %vm581_vm0, %v1272_v14, %v1303_v1  ;;  %v1314_v5 = vsel %vm581_vm0, %v1313_v55, %v1264_v31  ;;  %v1325_v52 = vrot.slane %v1296_v2, 4 }
 0x168   : > { %v1312_v25 = vperm.slane %v1304_v24, %v2410_v40 }
 0x169   : > { %v436_v39 = vpop.permute.xlu1 %435  ;;  %v1302_v17 = vsel %vm581_vm0, %v1301_v32, %v1260_v21  ;;  %v1320_v32 = vperm.slane %v1314_v5, %v2410_v40 }
 0x16a   : > { %v1278_v23 = vsel %vm581_vm0, %v1277_v35, %v436_v39  ;;  %v1279_v42 = vrot.slane %v436_v39, 4  ;;  %v1308_v11 = vperm.slane %v1302_v17, %v2410_v40  ;;  %v1324_v35 = vperm.slane %v1316_v22, %v2410_v40 }
 0x16b   : > { %v1284_v29 = vperm.slane %v1278_v23, %v2357_v49  ;;  %v1355_v23 = vrot.slane %v1312_v25, 4  ;;  %v1359_v5 = vrot.slane %v1320_v32, 4 }
 0x16c   : > { %v1280_v1 = vsel %vm581_vm0, %v462_v46, %v1279_v42  ;;  %v1351_v55 = vrot.slane %v1308_v11, 4 }
 0x16d   : > { %v1288_v31 = vperm.slane %v1280_v1, %v2357_v49  ;;  %v1326_v57 = vsel %vm581_vm0, %v1325_v52, %v1284_v29  ;;  %v1327_v14 = vrot.slane %v1284_v29, 4 }
 0x16e   : > { %v1332_v21 = vperm.slane %v1326_v57, %v2410_v40 }
 0x16f   : > { %v1339_v39 = vrot.slane %v1288_v31, 4  ;;  %v1328_v17 = vsel %vm581_vm0, %v1296_v2, %v1327_v14  ;;  %v1338_v24 = vsel %vm581_vm0, %v1337_v50, %v1288_v31  ;;  %v1363_v14 = vrot.slane %v1324_v35, 4 }
 0x170   : > { %v1349_v4 = vrot.slane %v1332_v21, 4  ;;  %v1336_v46 = vperm.slane %v1328_v17, %v2410_v40  ;;  %v2807_v42 = vsel %vm581_vm0, %v1332_v21, %v1351_v55  ;;  %v1344_v52 = vperm.slane %v1338_v24, %v2410_v40 }
 0x171   : > { %v1340_v29 = vsel %vm581_vm0, %v1300_v3, %v1339_v39  ;;  %v1055_v17 = vrot.slane %v2740_v27, 4 }
 0x172   : > { %v2812_v1 = vsel %vm581_vm0, %v1349_v4, %v1308_v11  ;;  %v1353_v22 = vrot.slane %v1336_v46, 4  ;;  %v2815_v2 = vsel %vm581_vm0, %v1336_v46, %v1355_v23  ;;  %v2818_v50 = vsel %vm581_vm0, %v1344_v52, %v1359_v5 }
 0x173   : > { %3242 = vst [vmem:[#allocation15_spill] sm:$0xff] %v2818_v50  ;;  %v1357_v31 = vrot.slane %v1344_v52, 4  ;;  %v1348_v57 = vperm.slane %v1340_v29, %v2410_v40  ;;  %v1041_v11 = vrot.slane %v2368_v60, 4  ;;  %v1029_v23 = vrot.slane %v2756_v6, 4  ;;  %v2844_v60 = vpop.permute.xlu2 %494 }
 0x174   : > { %v2822_v21 = vsel %vm581_vm0, %v1353_v22, %v1312_v25  ;;  %v1067_v6 = vrot.slane %v2754_v59, 4 }
 0x175   : > { %v2825_v55 = vsel %vm581_vm0, %v1357_v31, %v1320_v32  ;;  %v1361_v3 = vrot.slane %v1348_v57, 4  ;;  %v2828_v4 = vsel %vm581_vm0, %v1348_v57, %v1363_v14  ;;  %v1042_v25 = vsel %vm581_vm0, %v1041_v11, %v2743_v36 }
 0x176   : > { %3243 = vst [vmem:[#allocation16_spill] sm:$0xff] %v2825_v55  ;;  %v1030_v46 = vsel %vm581_vm0, %v1029_v23, %v2618_v44  ;;  %v2842_v52 = vperm.slane %v1042_v25, %v2357_v49  ;;  %v1100_v44 = vperm.slane %v2769_v18, %v2410_v40 }
 0x177   : > { %3244 = vst [vmem:[#allocation17_spill] sm:$0xff] %v2828_v4  ;;  %v2832_v39 = vsel %vm581_vm0, %v1361_v3, %v1324_v35  ;;  %v2847_v35 = vperm.slane %v1030_v46, %v2357_v49  ;;  %v743_v4 = vrot.slane %v2624_v51, 4  ;;  %v514_v51 = vpop.permute.xlu0 %513 }
 0x178   : > { %3245 = vst [vmem:[#allocation18_spill] sm:$0xff] %v2832_v39  ;;  %v1077_v36 = vrot.slane %v2842_v52, 4 }
 0x179   : > { %v456_v24 = vpop.permute.xlu1 %455 }
 0x17a   : > { %v1056_v32 = vsel %vm581_vm0, %v456_v24, %v1055_v17  ;;  %v1053_v29 = vrot.slane %v456_v24, 4  ;;  %v1078_v11 = vsel %vm581_vm0, %v1077_v36, %v2847_v35  ;;  %v1139_v36 = vrot.slane %v1100_v44, 4 }
 0x17b   : > { %v1064_v5 = vperm.slane %v1056_v32, %v2357_v49  ;;  %v1096_v32 = vperm.slane %v2763_v8, %v2410_v40  ;;  %v1084_v46 = vperm.slane %v1078_v11, %v2410_v40 }
 0x17c   : > { %v1054_v17 = vsel %vm581_vm0, %v1053_v29, %v2740_v27  ;;  %v508_v27 = vpop.permute.xlu2 %507 }
 0x17d   : > { %v1115_v14 = vrot.slane %v1064_v5, 4  ;;  %v2872_v29 = vperm.slane %v1054_v17, %v2357_v49  ;;  %v1135_v11 = vrot.slane %v1096_v32, 4 }
 0x181   : > { %v469_v22 = vpop.permute.xlu1 %468 }
 0x182   : > { %v1065_v31 = vrot.slane %v469_v22, 4  ;;  %v1068_v57 = vsel %vm581_vm0, %v469_v22, %v1067_v6  ;;  %v767_v22 = vrot.slane %v2634_v12, 4 }
 0x183   : > { %v1076_v3 = vperm.slane %v1068_v57, %v2357_v49 }
 0x184   : > { %v1066_v23 = vsel %vm581_vm0, %v1065_v31, %v2754_v59 }
 0x185   : > { %v2863_v24 = vperm.slane %v1066_v23, %v2357_v49  ;;  %v1113_v25 = vrot.slane %v1076_v3, 4  ;;  %v1116_v18 = vsel %vm581_vm0, %v1076_v3, %v1115_v14  ;;  %v768_v3 = vsel %vm581_vm0, %v2627_v16, %v767_v22 }
 0x186   : > { %v1124_v6 = vperm.slane %v1116_v18, %v2410_v40  ;;  %v1127_v23 = vrot.slane %v1084_v46, 4  ;;  %v2894_v16 = vperm.slane %v768_v3, %v2410_v40 }
 0x187   : > { %v1101_v59 = vrot.slane %v2863_v24, 4  ;;  %v1114_v31 = vsel %vm581_vm0, %v1113_v25, %v1064_v5 }
 0x188   : > { %v1120_v57 = vperm.slane %v1114_v31, %v2410_v40  ;;  %v2878_v8 = vsel %vm581_vm0, %v1124_v6, %v1139_v36  ;;  %v1137_v14 = vrot.slane %v1124_v6, 4 }
 0x189   : > { %v1102_v12 = vsel %vm581_vm0, %v1101_v59, %v2872_v29  ;;  %v527_v31 = vpop.permute.xlu2 %526 }
 0x18a   : > { %v1108_v17 = vperm.slane %v1102_v12, %v2410_v40  ;;  %v1133_v18 = vrot.slane %v1120_v57, 4  ;;  %v2887_v5 = vsel %vm581_vm0, %v1120_v57, %v1135_v11  ;;  %v2890_v25 = vsel %vm581_vm0, %v1137_v14, %v1100_v44 }
 0x18b   : > { %v744_v44 = vsel %vm581_vm0, %v2614_v62, %v743_v4  ;;  %v1365_v57 = vrot.slane %v514_v51, 4  ;;  %v793_v14 = vrot.slane %v2894_v16, 4  ;;  %v1377_v62 = vrot.slane %v527_v31, 4 }
 0x18c   : > { %v1125_v6 = vrot.slane %v1108_v17, 4  ;;  %v1128_v36 = vsel %vm581_vm0, %v1108_v17, %v1127_v23  ;;  %v2897_v22 = vsel %vm581_vm0, %v1133_v18, %v1096_v32  ;;  %v2907_v3 = vperm.slane %v744_v44, %v2410_v40 }
 0x18d   : > { %1485 = vrot.lane.b32.xlu1 %v1128_v36, %s2176_s17 }
 0x18e   : > { %v2901_v59 = vsel %vm581_vm0, %v1125_v6, %v1084_v46  ;;  %v794_v17 = vsel %vm581_vm0, %v793_v14, %v2907_v3 }
 0x191   : > { %v488_v12 = vpop.permute.xlu1 %487  ;;  %v2915_v4 = vpop.permute.xlu2 %539 }
 0x192   : > { %v1367_v11 = vrot.slane %v488_v12, 4  ;;  %v1366_v32 = vsel %vm581_vm0, %v1365_v57, %v488_v12 }
 0x193   : > { %v1372_v23 = vperm.slane %v1366_v32, %v2357_v49 }
 0x194   : > { %v1368_v46 = vsel %vm581_vm0, %v514_v51, %v1367_v11 }
 0x195   : > { %1499 = vrot.lane.b32.xlu1 %v794_v17, %s2175_s16  ;;  %v1376_v18 = vperm.slane %v1368_v46, %v2357_v49  ;;  %v1415_v39 = vrot.slane %v1372_v23, 4 }
 0x197   : > { %v1427_v12 = vrot.slane %v1376_v18, 4 }
 0x199   : > { %v501_v6 = vpop.permute.xlu1 %500 }
 0x19a   : > { %v1378_v36 = vsel %vm581_vm0, %v1377_v62, %v501_v6  ;;  %v1379_v44 = vrot.slane %v501_v6, 4 }
 0x19b   : > { %v1384_v57 = vperm.slane %v1378_v36, %v2357_v49 }
 0x19c   : > { %v1380_v14 = vsel %vm581_vm0, %v527_v31, %v1379_v44  ;;  %v1143_v31 = vrot.slane %v2383_v9, 4  ;;  %v1141_v44 = vrot.slane %v508_v27, 4 }
 0x19d   : > { %v1388_v17 = vperm.slane %v1380_v14, %v2357_v49  ;;  %v1413_v51 = vrot.slane %v1384_v57, 4  ;;  %1513 = vrot.lane.b32.xlu1 %v2493_v7, %s2177_s18  ;;  %v2925_v11 = vsel %vm581_vm0, %v1384_v57, %v1415_v39  ;;  %v1155_v39 = vrot.slane %v2844_v60, 4 }
 0x19e   : > { %v1144_v7 = vsel %vm581_vm0, %v508_v27, %v1143_v31  ;;  %v1142_v57 = vsel %vm581_vm0, %v1141_v44, %v2383_v9 }
 0x19f   : > { %v1425_v32 = vrot.slane %v1388_v17, 4  ;;  %v2928_v46 = vsel %vm581_vm0, %v1413_v51, %v1372_v23  ;;  %v2931_v62 = vsel %vm581_vm0, %v1388_v17, %v1427_v12  ;;  %v1152_v23 = vperm.slane %v1144_v7, %v2357_v49 }
 0x1a0   : > { %v1148_v58 = vperm.slane %v1142_v57, %v2357_v49 }
 0x1a1   : > { %v2934_v6 = vpop.permute.xlu2 %559  ;;  %v2937_v36 = vsel %vm581_vm0, %v1425_v32, %v1376_v18  ;;  %v1203_v32 = vrot.slane %v1152_v23, 4 }
 0x1a2   : > { %v1191_v48 = vrot.slane %v1148_v58, 4 }
 0x1a9   : > { %v573_v14 = vpop.permute.xlu2 %572  ;;  %v521_v12 = vpop.permute.xlu1 %520 }
 0x1aa   : > { %v1177_v17 = vrot.slane %v573_v14, 4  ;;  %v1153_v51 = vrot.slane %v521_v12, 4  ;;  %v1156_v15 = vsel %vm581_vm0, %v521_v12, %v1155_v39 }
 0x1ab   : > { %v1164_v18 = vperm.slane %v1156_v15, %v2357_v49  ;;  %v1165_v15 = vrot.slane %v2934_v6, 4 }
 0x1ac   : > { %v1178_v27 = vsel %vm581_vm0, %v1177_v17, %v2391_v19  ;;  %v1154_v31 = vsel %vm581_vm0, %v1153_v51, %v2844_v60  ;;  %v1103_v51 = vrot.slane %v2872_v29, 4  ;;  %v1079_v29 = vrot.slane %v2847_v35, 4 }
 0x1ad   : > { %v1160_v9 = vperm.slane %v1154_v31, %v2357_v49  ;;  %v1201_v44 = vrot.slane %v1164_v18, 4  ;;  %v2953_v7 = vsel %vm581_vm0, %v1164_v18, %v1203_v32  ;;  %v1184_v39 = vperm.slane %v1178_v27, %v2357_v49 }
 0x1af   : > { %v1189_v12 = vrot.slane %v1160_v9, 4  ;;  %v2957_v57 = vsel %vm581_vm0, %v1201_v44, %v1152_v23  ;;  %v1192_v60 = vsel %vm581_vm0, %v1160_v9, %v1191_v48  ;;  %v1213_v32 = vrot.slane %v1184_v39, 4 }
 0x1b0   : > { %v1200_v55 = vperm.slane %v1192_v60, %v2410_v40  ;;  %v1104_v23 = vsel %vm581_vm0, %v2863_v24, %v1103_v51 }
 0x1b1   : > { %v534_v43 = vpop.permute.xlu1 %533  ;;  %v1190_v17 = vsel %vm581_vm0, %v1189_v12, %v1148_v58  ;;  %v1112_v12 = vperm.slane %v1104_v23, %v2410_v40 }
 0x1b2   : > { %v1166_v31 = vsel %vm581_vm0, %v1165_v15, %v534_v43  ;;  %v1196_v18 = vperm.slane %v1190_v17, %v2410_v40  ;;  %v1167_v23 = vrot.slane %v534_v43, 4 }
 0x1b3   : > { %v1172_v27 = vperm.slane %v1166_v31, %v2357_v49  ;;  %v1243_v31 = vrot.slane %v1200_v55, 4 }
 0x1b4   : > { %v1239_v48 = vrot.slane %v1196_v18, 4 }
 0x1b5   : > { %v1215_v44 = vrot.slane %v1172_v27, 4  ;;  %v1214_v50 = vsel %vm581_vm0, %v1213_v32, %v1172_v27  ;;  %v1129_v32 = vrot.slane %v1112_v12, 4 }
 0x1b6   : > { %v1220_v58 = vperm.slane %v1214_v50, %v2410_v40  ;;  %v1080_v50 = vsel %vm581_vm0, %v2842_v52, %v1079_v29 }
 0x1b7   : > { %v1216_v9 = vsel %vm581_vm0, %v1184_v39, %v1215_v44  ;;  %v1088_v27 = vperm.slane %v1080_v50, %v2410_v40  ;;  %v1420_v50 = vperm.slane %v2928_v46, %v2410_v40 }
 0x1b8   : > { %v1240_v15 = vsel %vm581_vm0, %v1220_v58, %v1239_v48  ;;  %v1237_v17 = vrot.slane %v1220_v58, 4  ;;  %v1224_v60 = vperm.slane %v1216_v9, %v2410_v40  ;;  %v1179_v58 = vrot.slane %v2391_v19, 4  ;;  %v579_v48 = vpop.permute.xlu0 %578 }
 0x1b9   : > { %1487 = vrot.lane.b32.xlu2 %v1240_v15, %s2176_s17  ;;  %v1130_v44 = vsel %vm581_vm0, %v1129_v32, %v1088_v27  ;;  %v1401_v52 = vrot.slane %v579_v48, 4 }
 0x1ba   : > { %v1244_v24 = vsel %vm581_vm0, %v1224_v60, %v1243_v31  ;;  %v1241_v51 = vrot.slane %v1224_v60, 4  ;;  %v2982_v35 = vsel %vm581_vm0, %v1237_v17, %v1196_v18  ;;  %v1131_v18 = vrot.slane %v1088_v27, 4 }
 0x1bb   : > { %1519 = vrot.lane.b32.xlu1 %v1244_v24, %s2177_s18  ;;  %v1180_v15 = vsel %vm581_vm0, %v573_v14, %v1179_v58  ;;  %v795_v14 = vrot.slane %v2907_v3, 4  ;;  %v1391_v24 = vrot.slane %v2915_v4, 4 }
 0x1bc   : > { %v1242_v39 = vsel %vm581_vm0, %v1241_v51, %v1200_v55  ;;  %v1168_v55 = vsel %vm581_vm0, %v2934_v6, %v1167_v23  ;;  %v1132_v19 = vsel %vm581_vm0, %v1112_v12, %v1131_v18  ;;  %v1188_v17 = vperm.slane %v1180_v15, %v2357_v49 }
 0x1bd   : > { %1503 = vrot.lane.b32.xlu0 %v1242_v39, %s2175_s16  ;;  %v1176_v60 = vperm.slane %v1168_v55, %v2357_v49  ;;  %v1432_v39 = vperm.slane %v2937_v36, %v2410_v40  ;;  %v1424_v36 = vperm.slane %v2925_v11, %v2410_v40 }
 0x1be   : > { %v1225_v32 = vrot.slane %v1188_v17, 4 }
 0x1bf   : > { %v1227_v3 = vrot.slane %v1176_v60, 4  ;;  %v1471_v55 = vrot.slane %v1432_v39, 4 }
 0x1c0   : > { %v1226_v46 = vsel %vm581_vm0, %v1225_v32, %v1176_v60 }
 0x1c1   : > { %v553_v9 = vpop.permute.xlu1 %552  ;;  %1501 = vrot.lane.b32.xlu2 %v1130_v44, %s2175_s16  ;;  %v1232_v11 = vperm.slane %v1226_v46, %v2410_v40 }
 0x1c2   : > { %v1403_v29 = vrot.slane %v553_v9, 4  ;;  %v1402_v31 = vsel %vm581_vm0, %v1401_v52, %v553_v9 }
 0x1c3   : > { %1533 = vrot.lane.b32.xlu1 %v2897_v22, %s2178_s22  ;;  %v796_v22 = vsel %vm581_vm0, %v2894_v16, %v795_v14  ;;  %v1408_v51 = vperm.slane %v1402_v31, %v2357_v49 }
 0x1c4   : > { %v1404_v43 = vsel %vm581_vm0, %v579_v48, %v1403_v29  ;;  %v1436_v48 = vperm.slane %v2931_v62, %v2410_v40 }
 0x1c5   : > { %1517 = vrot.lane.b32.xlu0 %v1132_v19, %s2177_s18  ;;  %v1412_v6 = vperm.slane %v1404_v43, %v2357_v49  ;;  %v1437_v9 = vrot.slane %v1408_v51, 4 }
 0x1c7   : > { %v1449_v44 = vrot.slane %v1412_v6, 4 }
 0x1c9   : > { %v566_v12 = vpop.permute.xlu1 %565  ;;  %1515 = vrot.lane.b32.xlu2 %v796_v22, %s2177_s18  ;;  %v1467_v22 = vrot.slane %v1424_v36, 4  ;;  %s1833_s18 = scalar_lea.hbm %s3230_s1, %s1944_s12 }
 0x1ca   : > { %v1389_v27 = vrot.slane %v566_v12, 4  ;;  %v1392_v23 = vsel %vm581_vm0, %v566_v12, %v1391_v24  ;;  %v1475_v12 = vrot.slane %v1436_v48, 4 }
 0x1cb   : > { %v1400_v16 = vperm.slane %v1392_v23, %v2357_v49  ;;  %1547 = vrot.lane.b32.xlu1 %v2669_v47, %s2179_s23  ;;  %v1228_v47 = vsel %vm581_vm0, %v1188_v17, %v1227_v3 }
 0x1cc   : > { %v1390_v58 = vsel %vm581_vm0, %v1389_v27, %v2915_v4  ;;  %v1463_v4 = vrot.slane %v1420_v50, 4  ;;  %v1236_v14 = vperm.slane %v1228_v47, %v2410_v40 }
 0x1cd   : > { %v1396_v52 = vperm.slane %v1390_v58, %v2357_v49  ;;  %v1450_v29 = vsel %vm581_vm0, %v1449_v44, %v1400_v16  ;;  %v1451_v18 = vrot.slane %v1400_v16, 4  ;;  %1531 = vrot.lane.b32.xlu0 %v2677_v63, %s2178_s22  ;;  %v1245_v44 = vrot.slane %v1232_v11, 4 }
 0x1ce   : > { %v1456_v15 = vperm.slane %v1450_v29, %v2410_v40 }
 0x1cf   : > { %v1439_v43 = vrot.slane %v1396_v52, 4  ;;  %v1438_v62 = vsel %vm581_vm0, %v1437_v9, %v1396_v52  ;;  %v1452_v19 = vsel %vm581_vm0, %v1412_v6, %v1451_v18 }
 0x1d0   : > { %v1444_v49 = vperm.slane %v1438_v62, %v2410_v40  ;;  %v1469_v60 = vrot.slane %v1456_v15, 4  ;;  %v3034_v31 = vsel %vm581_vm0, %v1456_v15, %v1471_v55  ;;  %v1460_v63 = vperm.slane %v1452_v19, %v2410_v40  ;;  %v3253_v19 = vld [vmem:[#allocation10_spill] sm:$0xff] }
 0x1d1   : > { %v1482_v17 = vpop.permute.xlu1 %1481  ;;  %1529 = vrot.lane.b32.xlu2 %v2507_v34, %s2178_s22  ;;  %v1440_v24 = vsel %vm581_vm0, %v1408_v51, %v1439_v43  ;;  %v3252_v43 = vld [vmem:[#allocation9_spill] sm:$0xff] }
 0x1d2   : > { %v1718_v6 = vsel %vm1717_vm1, %v2526_v26, %v1482_v17  ;;  %v1464_v32 = vsel %vm581_vm0, %v1444_v49, %v1463_v4  ;;  %v1461_v3 = vrot.slane %v1444_v49, 4  ;;  %v1448_v27 = vperm.slane %v1440_v24, %v2410_v40  ;;  %v3251_v4 = vld [vmem:[#allocation8_spill] sm:$0xff] }
 0x1d3   : > { %1561 = vrot.lane.b32.xlu1 %v2511_v0, %s2180_s24  ;;  %v3047_v23 = vsel %vm581_vm0, %v1469_v60, %v1432_v39  ;;  %v3050_v34 = vsel %vm581_vm0, %v1460_v63, %v1475_v12  ;;  %v1473_v51 = vrot.slane %v1460_v63, 4  ;;  %v1208_v0 = vperm.slane %v2957_v57, %v2410_v40  ;;  %v3249_v57 = vld [vmem:[#allocation12_spill] sm:$0xff] }
 0x1d4   : > { %v1462_v16 = vsel %vm581_vm0, %v1461_v3, %v1420_v50  ;;  %v1465_v58 = vrot.slane %v1448_v27, 4  ;;  %v1468_v26 = vsel %vm581_vm0, %v1448_v27, %v1467_v22  ;;  %v1249_v39 = vrot.slane %v1236_v14, 4 }
 0x1d5   : > { %1545 = vrot.lane.b32.xlu0 %v2521_v37, %s2179_s23  ;;  %v3057_v46 = vsel %vm581_vm0, %v1473_v51, %v1436_v48  ;;  %v1246_v52 = vsel %vm581_vm0, %v1245_v44, %v1208_v0  ;;  %v1212_v50 = vperm.slane %v2953_v7, %v2410_v40  ;;  %v1247_v18 = vrot.slane %v1208_v0, 4  ;;  %v3248_v7 = vld [vmem:[#allocation14_spill] sm:$0xff]  ;;  %v3250_v48 = vld [vmem:[#allocation13_spill] sm:$0xff]  ;;  %v3256_v44 = vld [vmem:[#allocation11_spill] sm:$0xff] }
 0x1d6   : > { %v1466_v9 = vsel %vm581_vm0, %v1465_v58, %v1424_v36 }
 0x1d7   : > { %v1250_v29 = vsel %vm581_vm0, %v1249_v39, %v1212_v50  ;;  %v1248_v37 = vsel %vm581_vm0, %v1232_v11, %v1247_v18  ;;  %v1251_v40 = vrot.slane %v1212_v50, 4 }
 0x1d9   : > { %1535 = vrot.lane.b32.xlu2 %v1246_v52, %s2178_s22 }
 0x1db   : > { %1567 = vrot.lane.b32.xlu1 %v1250_v29, %s2180_s24 }
 0x1dd   : > { %1551 = vrot.lane.b32.xlu0 %v1248_v37, %s2179_s23 }
 0x1e1   : > { %1549 = vrot.lane.b32.xlu2 %v2887_v5, %s2179_s23  ;;  %v1252_v5 = vsel %vm581_vm0, %v1236_v14, %v1251_v40  ;;  %vm1792_vm0 = vcmask 261120   ;;  %s1834_s23 = sshll.u32 %s3153_s15, 4  ;;  %s1835_s23 = int_to_ptr.vmem [resolvable:$true] %s1834_s23 }
 0x1e3   : > { %1581 = vrot.lane.b32.xlu1 %v2878_v8, %s2181_s25 }
 0x1e5   : > { %1565 = vrot.lane.b32.xlu0 %v2890_v25, %s2180_s24 }
 0x1e9   : > { %1563 = vrot.lane.b32.xlu2 %v2672_v61, %s2180_s24  ;;  %s1836_s24 = sshll.u32 %s1833_s18, 4  ;;  %s1837_s24 = int_to_ptr.hbm [resolvable:$true] %s1836_s24 }
 0x1eb   : > { %1595 = vrot.lane.b32.xlu1 %v2738_v20, %s2182_s26  ;;  %v1498_v20 = vpop.permute.xlu0 %1497 }
 0x1ed   : > { %1579 = vrot.lane.b32.xlu0 %v2662_v41, %s2181_s25 }
 0x1f1   : > { %1577 = vrot.lane.b32.xlu2 %v2534_v38, %s2181_s25  ;;  %v1484_v38 = vpop.permute.xlu2 %1483 }
 0x1f3   : > { %1609 = vrot.lane.b32.xlu1 %v2541_v28, %s2183_s27  ;;  %v1719_v28 = vsel %vm1717_vm1, %v2666_v30, %v1484_v38 }
 0x1f5   : > { %1593 = vrot.lane.b32.xlu0 %v2549_v13, %s2182_s26 }
 0x1f9   : > { %1583 = vrot.lane.b32.xlu2 %v1252_v5, %s2181_s25  ;;  %s1819_s25 = scalar_lea.sflag [#allocation4], %s2275_s5 }
 0x1fb   : > { %1615 = vrot.lane.b32.xlu1 %v1464_v32, %s2183_s27 }
 0x1fd   : > { %1599 = vrot.lane.b32.xlu0 %v1462_v16, %s2182_s26 }
 0x1ff   : > { %v1486_v8 = vpop.permute.xlu1 %1485 }
 0x200   : > { %v1720_v61 = vsel %vm1717_vm1, %v2901_v59, %v1486_v8  ;;  %v3247_v59 = vld [vmem:[#allocation16_spill] sm:$0xff] }
 0x201   : > { %1597 = vrot.lane.b32.xlu2 %v2812_v1, %s2182_s26  ;;  %s2101_s26 = sshra.s32 %s1837_s24, 4  ;;  %s2102_s26 = int_to_ptr.hbm [resolvable:$true] %s2101_s26 }
 0x202   : > { %p2108_p6 = scmp.lt.s32.totalorder %s2102_s26, %s3230_s1 }
 0x203   : > { %1629 = vrot.lane.b32.xlu1 %v2822_v21, %s2184_s28  ;;  %v1723_v21 = vsel %vm1722_vm2, %v1718_v6, %v1498_v20  ;;  %v3254_v6 = vld [vmem:[#allocation18_spill] sm:$0xff] }
 0x205   : > { %1613 = vrot.lane.b32.xlu0 %v2807_v42, %s2183_s27 }
 0x207   : > { %v1500_v13 = vpop.permute.xlu1 %1499 }
 0x208   : > { %v1724_v41 = vsel %vm1722_vm2, %v1719_v28, %v1500_v13 }
 0x209   : > { %1611 = vrot.lane.b32.xlu2 %v2729_v45, %s2183_s27  ;;  %s2103_s27 = scalar_lea.hbm %s2102_s26, 32 }
 0x20a   : > { %p2104_p3 = scmp.ne.s32.totalorder %s2102_s26, %s2103_s27 }
 0x20b   : > { %1643 = vrot.lane.b32.xlu1 %v2719_v53, %s2185_s29 }
 0x20c   : > { %p2105_p4 = pnand %p2104_p3, %p2253_p9 }
 0x20d   : > { %1627 = vrot.lane.b32.xlu0 %v2732_v56, %s2184_s28 }
 0x20e   : > { %p2106_p5 = pneg %p2105_p4 }
 0x20f   : > { %v1514_v1 = vpop.permute.xlu1 %1513 }
 0x210   : > { %v1728_v42 = vsel %vm1727_vm3, %v1723_v21, %v1514_v1 }
 0x211   : > { %1625 = vrot.lane.b32.xlu2 %v2564_v33, %s2184_s28  ;;  %v3246_v33 = vld [vmem:[#allocation15_spill] sm:$0xff] }
 0x213   : > { %v1488_v30 = vpop.permute.xlu2 %1487  ;;  %1657 = vrot.lane.b32.xlu1 %v2552_v54, %s2186_s30 }
 0x214   : > { %v1721_v45 = vsel %vm1717_vm1, %v2982_v35, %v1488_v30  ;;  %vm1813_vm1 = vcmask 523520  }
 0x215   : > { %1641 = vrot.lane.b32.xlu0 %v2555_v10, %s2185_s29 }
 0x219   : > { %1631 = vrot.lane.b32.xlu2 %v1466_v9, %s2184_s28 }
 0x21b   : > { %v1502_v53 = vpop.permute.xlu2 %1501  ;;  %1663 = vrot.lane.b32.xlu1 %v3047_v23, %s2186_s30  ;;  %v3255_v23 = vld [vmem:[#allocation17_spill] sm:$0xff] }
 0x21c   : > { %v1725_v56 = vsel %vm1722_vm2, %v1720_v61, %v1502_v53 }
 0x21d   : > { %1647 = vrot.lane.b32.xlu0 %v1468_v26, %s2185_s29 }
 0x221   : > { %1645 = vrot.lane.b32.xlu2 %v2815_v2, %s2185_s29  ;;  %s2107_s29 = scalar_lea.hbm %s3230_s1, 128 }
 0x222   : > { %p2109_p7 = scmp.lt.s32.totalorder %s2107_s29, %s2103_s27 }
 0x223   : > { %v1516_v25 = vpop.permute.xlu2 %1515  ;;  %1677 = vrot.lane.b32.xlu1 %v3246_v33, %s2187_s2 }
 0x224   : > { %v1729_v54 = vsel %vm1727_vm3, %v1724_v41, %v1516_v25  ;;  %p2110_p8 = por %p2109_p7, %p2108_p6 }
 0x225   : > { %1661 = vrot.lane.b32.xlu0 %v3247_v59, %s2186_s30 }
 0x226   : > { %p2111_p10 = pnand %p2110_p8, %p2106_p5 }
 0x229   : > { %1659 = vrot.lane.b32.xlu2 %v3248_v7, %s2186_s30 }
 0x22b   : > { %v1530_v10 = vpop.permute.xlu2 %1529  ;;  %1691 = vrot.lane.b32.xlu1 %v3249_v57, %s2188_s3 }
 0x22c   : > { %v1733_v35 = vsel %vm1732_vm4, %v1728_v42, %v1530_v10 }
 0x22d   : > { %v1520_v36 = vpop.permute.xlu1 %1519  ;;  %1675 = vrot.lane.b32.xlu0 %v3250_v48, %s2187_s2 }
 0x22f   : > { %v1504_v2 = vpop.permute.xlu0 %1503 }
 0x230   : > { %v1726_v47 = vsel %vm1722_vm2, %v1721_v45, %v1504_v2 }
 0x231   : > { %1673 = vrot.lane.b32.xlu2 %v3251_v4, %s2187_s2  ;;  %v1731_v15 = vsel %vm1727_vm3, %v1726_v47, %v1520_v36 }
 0x233   : > { %v1536_v55 = vpop.permute.xlu2 %1535  ;;  %1705 = vrot.lane.b32.xlu1 %v3252_v43, %s2189_s4 }
 0x234   : > { %v1736_v11 = vsel %vm1732_vm4, %v1731_v15, %v1536_v55 }
 0x235   : > { %v1534_v62 = vpop.permute.xlu1 %1533  ;;  %1689 = vrot.lane.b32.xlu0 %v3253_v19, %s2188_s3 }
 0x237   : > { %v1518_v49 = vpop.permute.xlu0 %1517 }
 0x238   : > { %v1730_v60 = vsel %vm1727_vm3, %v1725_v56, %v1518_v49 }
 0x239   : > { %1679 = vrot.lane.b32.xlu2 %v3034_v31, %s2187_s2  ;;  %v1735_v63 = vsel %vm1732_vm4, %v1730_v60, %v1534_v62 }
 0x23b   : > { %v1550_v17 = vpop.permute.xlu2 %1549  ;;  %1711 = vrot.lane.b32.xlu1 %v3050_v34, %s2189_s4 }
 0x23c   : > { %v1740_v14 = vsel %vm1737_vm5, %v1735_v63, %v1550_v17 }
 0x23d   : > { %v1548_v24 = vpop.permute.xlu1 %1547  ;;  %1695 = vrot.lane.b32.xlu0 %v3057_v46, %s2188_s3 }
 0x23f   : > { %v1532_v22 = vpop.permute.xlu0 %1531 }
 0x240   : > { %v1734_v12 = vsel %vm1732_vm4, %v1729_v54, %v1532_v22 }
 0x241   : > { %1693 = vrot.lane.b32.xlu2 %v3254_v6, %s2188_s3  ;;  %v1739_v32 = vsel %vm1737_vm5, %v1734_v12, %v1548_v24 }
 0x243   : > { %v1564_v31 = vpop.permute.xlu2 %1563 }
 0x244   : > { %v1744_v3 = vsel %vm1742_vm6, %v1739_v32, %v1564_v31 }
 0x245   : > { %v1562_v27 = vpop.permute.xlu1 %1561  ;;  %1709 = vrot.lane.b32.xlu0 %v3255_v23, %s2189_s4 }
 0x247   : > { %v1546_v34 = vpop.permute.xlu0 %1545 }
 0x248   : > { %v1738_v51 = vsel %vm1737_vm5, %v1733_v35, %v1546_v34 }
 0x249   : > { %1707 = vrot.lane.b32.xlu2 %v3256_v44, %s2189_s4  ;;  %v1743_v16 = vsel %vm1742_vm6, %v1738_v51, %v1562_v27 }
 0x24b   : > { %v1578_v58 = vpop.permute.xlu2 %1577 }
 0x24c   : > { %v1748_v26 = vsel %vm1747_vm7, %v1743_v16, %v1578_v58 }
 0x24d   : > { %v1568_v46 = vpop.permute.xlu1 %1567 }
 0x24f   : > { %v1552_v0 = vpop.permute.xlu0 %1551 }
 0x250   : > { %v1741_v39 = vsel %vm1737_vm5, %v1736_v11, %v1552_v0 }
 0x251   : > { %v1746_v9 = vsel %vm1742_vm6, %v1741_v39, %v1568_v46 }
 0x253   : > { %v1584_v52 = vpop.permute.xlu2 %1583 }
 0x254   : > { %v1751_v50 = vsel %vm1747_vm7, %v1746_v9, %v1584_v52 }
 0x255   : > { %v1582_v29 = vpop.permute.xlu1 %1581 }
 0x257   : > { %v1566_v18 = vpop.permute.xlu0 %1565 }
 0x258   : > { %v1745_v37 = vsel %vm1742_vm6, %v1740_v14, %v1566_v18 }
 0x259   : > { %v1750_v40 = vsel %vm1747_vm7, %v1745_v37, %v1582_v29 }
 0x25b   : > { %v1598_v5 = vpop.permute.xlu2 %1597 }
 0x25c   : > { %v3135_v8 = vsel %vm1752_vm8, %v1750_v40, %v1598_v5 }
 0x25d   : > { %v1596_v61 = vpop.permute.xlu1 %1595 }
 0x25f   : > { %v1580_v38 = vpop.permute.xlu0 %1579 }
 0x260   : > { %v1749_v48 = vsel %vm1747_vm7, %v1744_v3, %v1580_v38 }
 0x261   : > { %v1754_v47 = vsel %vm1752_vm8, %v1749_v48, %v1596_v61 }
 0x263   : > { %v1612_v28 = vpop.permute.xlu2 %1611 }
 0x264   : > { %v1759_v4 = vsel %vm1757_vm9, %v1754_v47, %v1612_v28 }
 0x265   : > { %v1610_v13 = vpop.permute.xlu1 %1609 }
 0x267   : > { %v1594_v41 = vpop.permute.xlu0 %1593 }
 0x268   : > { %v1753_v11 = vsel %vm1752_vm8, %v1748_v26, %v1594_v41 }
 0x269   : > { %v1758_v63 = vsel %vm1757_vm9, %v1753_v11, %v1610_v13 }
 0x26b   : > { %v1626_v20 = vpop.permute.xlu2 %1625 }
 0x26c   : > { %v1763_v17 = vsel %vm1762_vm10, %v1758_v63, %v1626_v20 }
 0x26d   : > { %v1616_v1 = vpop.permute.xlu1 %1615 }
 0x26f   : > { %v1600_v21 = vpop.permute.xlu0 %1599 }
 0x270   : > { %v1756_v6 = vsel %vm1752_vm8, %v1751_v50, %v1600_v21 }
 0x271   : > { %v1761_v34 = vsel %vm1757_vm9, %v1756_v6, %v1616_v1 }
 0x273   : > { %v1632_v42 = vpop.permute.xlu2 %1631 }
 0x274   : > { %v1766_v44 = vsel %vm1762_vm10, %v1761_v34, %v1632_v42 }
 0x275   : > { %v1630_v30 = vpop.permute.xlu1 %1629 }
 0x277   : > { %v1614_v45 = vpop.permute.xlu0 %1613 }
 0x278   : > { %v1760_v58 = vsel %vm1757_vm9, %v3135_v8, %v1614_v45 }
 0x279   : > { %v1765_v52 = vsel %vm1762_vm10, %v1760_v58, %v1630_v30 }
 0x27b   : > { %v1646_v53 = vpop.permute.xlu2 %1645 }
 0x27c   : > { %v1770_v29 = vsel %vm1767_vm12, %v1765_v52, %v1646_v53 }
 0x27d   : > { %v1644_v56 = vpop.permute.xlu1 %1643 }
 0x27f   : > { %v1628_v25 = vpop.permute.xlu0 %1627 }
 0x280   : > { %v1764_v15 = vsel %vm1762_vm10, %v1759_v4, %v1628_v25 }
 0x281   : > { %v1769_v62 = vsel %vm1767_vm12, %v1764_v15, %v1644_v56 }
 0x283   : > { %v1660_v33 = vpop.permute.xlu2 %1659 }
 0x284   : > { %v1774_v19 = vsel %vm1772_vm11, %v1769_v62, %v1660_v33 }
 0x285   : > { %v1658_v54 = vpop.permute.xlu1 %1657 }
 0x287   : > { %v1642_v59 = vpop.permute.xlu0 %1641 }
 0x288   : > { %v1768_v14 = vsel %vm1767_vm12, %v1763_v17, %v1642_v59 }
 0x289   : > { %v1773_v32 = vsel %vm1772_vm11, %v1768_v14, %v1658_v54 }
 0x28b   : > { %v1674_v7 = vpop.permute.xlu2 %1673 }
 0x28c   : > { %v1778_v3 = vsel %vm1777_vm13, %v1773_v32, %v1674_v7 }
 0x28d   : > { %v1664_v10 = vpop.permute.xlu1 %1663 }
 0x28f   : > { %v1648_v57 = vpop.permute.xlu0 %1647 }
 0x290   : > { %v1771_v16 = vsel %vm1767_vm12, %v1766_v44, %v1648_v57 }
 0x291   : > { %v1776_v26 = vsel %vm1772_vm11, %v1771_v16, %v1664_v10 }
 0x293   : > { %v1680_v35 = vpop.permute.xlu2 %1679 }
 0x294   : > { %v1781_v46 = vsel %vm1777_vm13, %v1776_v26, %v1680_v35 }
 0x295   : > { %v1678_v36 = vpop.permute.xlu1 %1677 }
 0x297   : > { %v1662_v2 = vpop.permute.xlu0 %1661 }
 0x298   : > { %v1775_v18 = vsel %vm1772_vm11, %v1770_v29, %v1662_v2 }
 0x299   : > { %v1780_v37 = vsel %vm1777_vm13, %v1775_v18, %v1678_v36 }
 0x29b   : > { %v1694_v55 = vpop.permute.xlu2 %1693 }
 0x29c   : > { %v1785_v40 = vsel %vm1782_vm15, %v1780_v37, %v1694_v55 }
 0x29d   : > { %v1692_v43 = vpop.permute.xlu1 %1691 }
 0x29f   : > { %v1676_v49 = vpop.permute.xlu0 %1675 }
 0x2a0   : > { %v1779_v60 = vsel %vm1777_vm13, %v1774_v19, %v1676_v49 }
 0x2a1   : > { %v1784_v22 = vsel %vm1782_vm15, %v1779_v60, %v1692_v43 }
 0x2a3   : > { %v1708_v24 = vpop.permute.xlu2 %1707 }
 0x2a4   : > { %v1789_v12 = vsel %vm1787_vm14, %v1784_v22, %v1708_v24 }
 0x2a5   : > { %1803 = vrot.lane.b32.xlu0 %v1789_v12, %s2190_s13  ;;  %1794 = vst.msk [vmem:[%s3153_s15 + $0x8] sm:$0xff] %vm1792_vm0, %v1789_v12  ;;  %v1706_v31 = vpop.permute.xlu1 %1705 }
 0x2a7   : > { %v1690_v27 = vpop.permute.xlu0 %1689 }
 0x2a8   : > { %v1783_v23 = vsel %vm1782_vm15, %v1778_v3, %v1690_v27 }
 0x2a9   : > { %v1788_v51 = vsel %vm1787_vm14, %v1783_v23, %v1706_v31 }
 0x2aa   : > { %1801 = vrot.lane.b32.xlu2 %v1788_v51, %s2190_s13  ;;  %1793 = vst.msk [vmem:[%s3153_s15] sm:$0xff] %vm1792_vm0, %v1788_v51 }
 0x2ad   : > { %v1712_v39 = vpop.permute.xlu1 %1711 }
 0x2af   : > { %v1696_v0 = vpop.permute.xlu0 %1695 }
 0x2b0   : > { %v1786_v9 = vsel %vm1782_vm15, %v1781_v46, %v1696_v0 }
 0x2b1   : > { %v1791_v50 = vsel %vm1787_vm14, %v1786_v9, %v1712_v39 }
 0x2b2   : > { %1807 = vrot.lane.b32.xlu2 %v1791_v50, %s2190_s13  ;;  %1796 = vst.msk [vmem:[%s3153_s15 + $0x18] sm:$0xff] %vm1792_vm0, %v1791_v50 }
 0x2b7   : > { %v1710_v5 = vpop.permute.xlu0 %1709 }
 0x2b8   : > { %v1790_v8 = vsel %vm1787_vm14, %v1785_v40, %v1710_v5 }
 0x2b9   : > { %1805 = vrot.lane.b32.xlu1 %v1790_v8, %s2190_s13  ;;  %1795 = vst.msk [vmem:[%s3153_s15 + $0x10] sm:$0xff] %vm1792_vm0, %v1790_v8 }
 0x304   : > { %v1802_v61 = vpop.permute.xlu2 %1801 }
 0x305   : > { %1814 = vst.msk [vmem:[%s3153_s15] sm:$0xff] %vm1813_vm1, %v1802_v61 }
 0x30c   : > { %v1808_v38 = vpop.permute.xlu2 %1807 }
 0x30d   : > { %1817 = vst.msk [vmem:[%s3153_s15 + $0x18] sm:$0xff] %vm1813_vm1, %v1808_v38 }
 0x317   : > { %v1804_v28 = vpop.permute.xlu0 %1803 }
 0x318   : > { %1815 = vst.msk [vmem:[%s3153_s15 + $0x8] sm:$0xff] %vm1813_vm1, %v1804_v28 }
 0x32b   : > { %v1806_v13 = vpop.permute.xlu1 %1805 }
 0x32c   : > { %1816 = vst.msk [vmem:[%s3153_s15 + $0x10] sm:$0xff] %vm1813_vm1, %v1806_v13 }
 0x32d   : > { %2114 = shalt.err (!%p2111_p10)
}
 0x32e   : > { %s2191_s5 = smov 128  }
 0x32f   : > { %1947 = dma.vmem_to_hbm [thread:$0]  (%p2253_p9), %s1835_s23, 512, %s1837_s24, %s1819_s25, %s2191_s5, %s2191_s5, %s2178_s22  }
 0x330 PF: > { %p1958_p12 = scmp.ge.s32.totalorder %s2169_s11, 2  ;;  %s1851_s3 = sand.u32 1, %s2149_s6  }
 0x331   : > { %s1852_s4 = scalar_lea.sflag [#allocation4], %s1851_s3 }
 0x332   : > { %p1954_p13 = pnand %p1958_p12, %p2260_p11 }
 0x334   : > { %p1955_p0 = pneg %p1954_p13 }
 0x336   : > { %2144 = dma.done.wait (%p1955_p0), %s1852_s4, 512  }
 0x337   : > { %2146 = vsyncadd (%p1955_p0), %s1852_s4, 4294966784  ;;  %s17_s11 = sadd.s32 1, %s2169_s11   ;;  %s3257_s6 = smov %s2153_s7 }
 0x338   : > { %p14_p1 = scmp.ge.s32.totalorder %s17_s11, 6   ;;  %s3258_s7 = smov %s2157_s8 }
 0x339   : > { %s3259_s8 = smov %s2258_s20  ;;  %s3260_s9 = smov %s2165_s10 }
 0x33a   : > { %s3261_s10 = smov %s3263_s14  ;;  %16 = sbr.rel (!%p14_p1) target bundleno = 6 (0x6), region = 69 }
 0x33f   :  { %1858 = vsyncpa [#allocation3], 1 }
 0x340   :  { %1860 = vsyncpa [#allocation3 + $0x1], 1 }
 0x341   :  { %1861 = vsyncpa [#allocation4], 1 }
 0x342   :  { %1863 = vsyncpa [#allocation4 + $0x1], 1 }

</bundles_post_ra>
